<compile_context>
chip_gen: v7x
topology: tpu7x:2x2x1
jax: 0.10.0
libtpu: 0.0.40
codegen_flags: <defaults>
</compile_context>

<pallas_src>
import numpy as np
import jax
import jax.numpy as jnp
from jax import lax
from jax.experimental import pallas as pl
from jax.experimental.pallas import tpu as pltpu


def _pick_time_chunk(T, B, I, H, bytes_budget=8 << 20):
    """Pick a time-chunk length Tt whose per-chunk VMEM footprint fits a budget.

    Per chunk (f32): 2x (Tt*B*I) input DMA buffers + 2x (Tt*B*H) output DMA
    buffers + 1x (Tt*B*H) input-projection scratch (weights excluded: invariant).
    Conservative enough for v7x's smaller (64 MiB) VMEM.
    """
    per_t = 4 * B * (2 * I + 3 * H)
    tt = max(1, bytes_budget // max(per_t, 1))
    return int(min(T, tt, 128))


def make_rnn_layer(T_pad, B, I, H, Tt, *, reverse, out_dtype,
                   single_buffer_invariants=True):
    """Builds the pallas_call for fixed (T_pad, B, I, H, Tt, reverse)."""
    assert T_pad % Tt == 0
    n_chunks = T_pad // Tt

    def time_block(c):
        return (n_chunks - 1 - c) if reverse else c

    def kernel(bs_ref,                              # scalar prefetch: [T_pad] int32 (SMEM)
               x_ref, h0_ref, wih_ref, whh_ref, b_ref,   # inputs
               out_ref, hlast_ref,                  # outputs
               state_sc, init_sc, xw_sc):           # VMEM scratch
        c = pl.program_id(0)
        nprog = pl.num_programs(0)

        @pl.when(c == 0)
        def _init():
            h0 = h0_ref[...].astype(jnp.float32)
            state_sc[...] = h0
            init_sc[...] = h0

        # time-block index handled by this chunk
        tb = (nprog - 1 - c) if reverse else c

        # One big input projection for the whole chunk, biases (b_ih+b_hh) fused:
        # keeps the MXU M-dim at Tt*B and removes per-step bias adds / 2nd matmul.
        xw_sc[...] = (jnp.dot(x_ref[...], wih_ref[...],
                              preferred_element_type=jnp.float32)
                      + b_ref[...].astype(jnp.float32))

        # Hoisted out of the recurrent loop (JAX does not CSE broadcast_in_dim).
        row = lax.broadcasted_iota(jnp.int32, (B, H), 0)

        def step(jj, carry):
            j = (Tt - 1 - jj) if reverse else jj         # local step inside chunk
            t = tb * Tt + j                               # global (padded) time index
            b_t = bs_ref[t]                               # current batch size (0 on pad steps)
            t_prev = jnp.clip(t + 1 if reverse else t - 1, 0, T_pad - 1)
            last_bs = bs_ref[t_prev]                      # len(state) before this step
            # rows [0, last_bs): carried state; rows >= last_bs: re-seed from init_state.
            h_eff = jnp.where(row < last_bs, state_sc[...], init_sc[...])

            off = pl.multiple_of(j * jnp.int32(B), B)
            pre = xw_sc[pl.ds(off, B), :] + jnp.dot(
                h_eff, whh_ref[...], preferred_element_type=jnp.float32)
            new_h = jnp.tanh(pre)                         # [B, H] fp32

            state_sc[...] = jnp.where(row < b_t, new_h, state_sc[...])
            # Unmasked store: rows >= b_t are garbage but never read by the packer.
            out_ref[pl.ds(off, B), :] = new_h.astype(out_ref.dtype)
            return carry

        lax.fori_loop(0, Tt, step, 0, unroll=min(Tt, 8))

        # Final state is only needed once, after the last processed chunk.
        @pl.when(c == nprog - 1)
        def _finalize():
            hlast_ref[...] = state_sc[...].astype(hlast_ref.dtype)

    inv_kwargs = {}
    if single_buffer_invariants:
        # Invariant operands never change block index -> no need to double-buffer.
        inv_kwargs = dict(pipeline_mode=pl.Buffered(1))

    grid_spec = pltpu.PrefetchScalarGridSpec(
        num_scalar_prefetch=1,
        grid=(n_chunks,),
        in_specs=[
            pl.BlockSpec((Tt * B, I), lambda c, bs: (time_block(c), 0)),   # x (time-flattened)
            pl.BlockSpec((B, H), lambda c, bs: (0, 0), **inv_kwargs),      # h0
            pl.BlockSpec((I, H), lambda c, bs: (0, 0), **inv_kwargs),      # W_ih
            pl.BlockSpec((H, H), lambda c, bs: (0, 0), **inv_kwargs),      # W_hh
            pl.BlockSpec((1, H), lambda c, bs: (0, 0), **inv_kwargs),      # b_ih + b_hh
        ],
        out_specs=[
            pl.BlockSpec((Tt * B, H), lambda c, bs: (time_block(c), 0)),   # padded outputs
            pl.BlockSpec((B, H), lambda c, bs: (0, 0)),                    # final state
        ],
        scratch_shapes=[
            pltpu.VMEM((B, H), jnp.float32),        # running state
            pltpu.VMEM((B, H), jnp.float32),        # init_state copy
            pltpu.VMEM((Tt * B, H), jnp.float32),   # per-chunk input projection
        ],
    )

    return pl.pallas_call(
        kernel,
        out_shape=(jax.ShapeDtypeStruct((T_pad * B, H), out_dtype),
                   jax.ShapeDtypeStruct((B, H), out_dtype)),
        grid_spec=grid_spec,
        compiler_params=pltpu.CompilerParams(
            dimension_semantics=("arbitrary",)),   # sequential time recurrence
    )


def cus_rnn_layer_forward(x, h0, batch_sizes, wih, whh, bih, bhh,
                          reverse=False, time_chunk=None):
    """Mirrors CusRNNLayer.forward (inference, dropout disabled).

    Returns (packed_outputs [sum(batch_sizes), H],
             final_state    [batch_sizes[0 if reverse else -1], H]).
    """
    T, B, I = x.shape
    H = h0.shape[1]
    bs_np = np.asarray(batch_sizes, dtype=np.int32)

    if time_chunk is None:
        time_chunk = _pick_time_chunk(T, B, I, H)
    Tt = int(max(1, min(int(time_chunk), T)))
    n_chunks = -(-T // Tt)
    T_pad = n_chunks * Tt

    # Pad time with zero-batch steps (no-ops inside the kernel).
    x_pad = x if T_pad == T else jnp.concatenate(
        [x, jnp.zeros((T_pad - T, B, I), x.dtype)], axis=0)
    x_flat = x_pad.reshape(T_pad * B, I)     # lane-dense, time-flattened layout

    bs_pad = np.zeros((T_pad,), np.int32)
    bs_pad[:T] = bs_np
    bs_dev = jnp.asarray(bs_pad)

    b_comb = (bih + bhh).reshape(1, H).astype(jnp.float32)   # fold both biases once

    args = (bs_dev, x_flat, h0, wih, whh, b_comb)
    try:
        f = make_rnn_layer(T_pad, B, I, H, Tt, reverse=reverse,
                           out_dtype=x.dtype, single_buffer_invariants=True)
        out_flat, h_last = f(*args)
    except Exception:
        # pl.Buffered(1) unsupported on this jax/libtpu -> default double-buffered specs.
        f = make_rnn_layer(T_pad, B, I, H, Tt, reverse=reverse,
                           out_dtype=x.dtype, single_buffer_invariants=False)
        out_flat, h_last = f(*args)

    # Glue: gather the first batch_sizes[t] rows of every real timestep
    # (torch.cat(outputs) order).
    idx = np.concatenate([t * B + np.arange(int(b)) for t, b in enumerate(bs_np)])
    packed = out_flat[jnp.asarray(idx)]
    last_t = 0 if reverse else T - 1
    final_state = h_last[: int(bs_np[last_t])]
    return packed, final_state


def ref_forward(x, h0, batch_sizes, wih, whh, bih, bhh, reverse=False):
    """Pure-JAX reference following the PyTorch loop exactly."""
    T = x.shape[0]
    steps = list(reversed(range(T))) if reverse else list(range(T))
    state = h0
    init_state = h0
    outs = []
    for t in steps:
        last_bs, bsz = state.shape[0], int(batch_sizes[t])
        if last_bs < bsz:
            state = jnp.concatenate([state, init_state[last_bs:bsz]], axis=0)
        else:
            state = state[:bsz]
        state = jnp.tanh(x[t, :bsz] @ wih + bih + state @ whh + bhh)
        outs.append(state)
    if reverse:
        outs.reverse()
    return jnp.concatenate(outs, axis=0), state


if __name__ == "__main__":
    # seq=8, max batch=8, input=64, hidden=128 (lane-dense output: H % 128 == 0)
    T, B, I, H = 8, 8, 64, 128
    batch_sizes = np.array([8, 8, 7, 6, 5, 3, 2, 1], dtype=np.int32)  # packed-seq sizes

    key = jax.random.PRNGKey(0)
    kx, kh, k1, k2, k3, k4 = jax.random.split(key, 6)
    x = jax.random.normal(kx, (T, B, I), dtype=jnp.float32)
    h0 = jax.random.normal(kh, (B, H), dtype=jnp.float32)

    bound = 1.0 / np.sqrt(H)           # PyTorch RNNCell init: U(-1/sqrt(H), 1/sqrt(H))
    wih = jax.random.uniform(k1, (I, H), minval=-bound, maxval=bound, dtype=jnp.float32)
    whh = jax.random.uniform(k2, (H, H), minval=-bound, maxval=bound, dtype=jnp.float32)
    bih = jax.random.uniform(k3, (H,),   minval=-bound, maxval=bound, dtype=jnp.float32)
    bhh = jax.random.uniform(k4, (H,),   minval=-bound, maxval=bound, dtype=jnp.float32)

    # (reverse, time_chunk): multi-chunk forward, reverse with time padding,
    # and single-chunk forward.
    for reverse, tchunk in ((False, 4), (True, 3), (False, 8)):
        packed, final_state = cus_rnn_layer_forward(
            x, h0, batch_sizes, wih, whh, bih, bhh,
            reverse=reverse, time_chunk=tchunk)
        jax.block_until_ready((packed, final_state))

        ref_packed, ref_final = ref_forward(
            x, h0, batch_sizes, wih, whh, bih, bhh, reverse=reverse)
        np.testing.assert_allclose(np.asarray(packed), np.asarray(ref_packed),
                                   rtol=1e-4, atol=1e-4)
        np.testing.assert_allclose(np.asarray(final_state), np.asarray(ref_final),
                                   rtol=1e-4, atol=1e-4)

    print("KERNEL_OK")
</pallas_src>

<mosaic_0001>
module attributes {stable_mosaic.version = 11 : i64} {
  func.func @kernel(%arg0: i32, %arg1: memref<8xi32, #tpu.memory_space<smem>>, %arg2: memref<32x64xf32, #tpu.memory_space<vmem>>, %arg3: memref<8x128xf32, #tpu.memory_space<vmem>>, %arg4: memref<64x128xf32, #tpu.memory_space<vmem>>, %arg5: memref<128x128xf32, #tpu.memory_space<vmem>>, %arg6: memref<1x128xf32, #tpu.memory_space<vmem>>, %arg7: memref<32x128xf32, #tpu.memory_space<vmem>>, %arg8: memref<8x128xf32, #tpu.memory_space<vmem>>, %arg9: memref<8x128xf32, #tpu.memory_space<vmem>>, %arg10: memref<8x128xf32, #tpu.memory_space<vmem>>, %arg11: memref<32x128xf32, #tpu.memory_space<vmem>>) attributes {dimension_semantics = [#tpu.dimension_semantics<arbitrary>], iteration_bounds = array<i64: 2>, scalar_prefetch = 1 : i64, scratch_operands = 3 : i64, tpu.core_type = #tpu.core_type<tc>, window_params = [{transform_indices = @transform_0, window_bounds = array<i64: 32, 64>}, {pipeline_mode = #tpu.pipeline_mode<synchronous>, transform_indices = @transform_1, window_bounds = array<i64: 8, 128>}, {pipeline_mode = #tpu.pipeline_mode<synchronous>, transform_indices = @transform_2, window_bounds = array<i64: 64, 128>}, {pipeline_mode = #tpu.pipeline_mode<synchronous>, transform_indices = @transform_3, window_bounds = array<i64: 128, 128>}, {pipeline_mode = #tpu.pipeline_mode<synchronous>, transform_indices = @transform_4, window_bounds = array<i64: 1, 128>}, {transform_indices = @transform_5, window_bounds = array<i64: 32, 128>}, {pipeline_mode = #tpu.pipeline_mode<synchronous>, transform_indices = @transform_6, window_bounds = array<i64: 8, 128>}]} {
    %c0_i32 = arith.constant 0 : i32
    %0 = arith.cmpi eq, %arg0, %c0_i32 : i32
    %1 = arith.extui %0 : i1 to i32
    %c0_i32_0 = arith.constant 0 : i32
    %2 = arith.cmpi ne, %1, %c0_i32_0 : i32
    scf.if %2 {
      %c0_81 = arith.constant 0 : index
      %c0_82 = arith.constant 0 : index
      %130 = vector.load %arg3[%c0_81, %c0_82] : memref<8x128xf32, #tpu.memory_space<vmem>>, vector<8x128xf32>
      %c0_83 = arith.constant 0 : index
      %c0_84 = arith.constant 0 : index
      %131 = vector.load %arg9[%c0_83, %c0_84] : memref<8x128xf32, #tpu.memory_space<vmem>>, vector<8x128xf32>
      tpu.vector_store %arg9[%c0_83, %c0_84], %130 {strides = array<i32>} : memref<8x128xf32, #tpu.memory_space<vmem>>, vector<8x128xf32>,
      %c0_85 = arith.constant 0 : index
      %c0_86 = arith.constant 0 : index
      %132 = vector.load %arg10[%c0_85, %c0_86] : memref<8x128xf32, #tpu.memory_space<vmem>>, vector<8x128xf32>
      tpu.vector_store %arg10[%c0_85, %c0_86], %130 {strides = array<i32>} : memref<8x128xf32, #tpu.memory_space<vmem>>, vector<8x128xf32>,
    } else {
    }
    %c0 = arith.constant 0 : index
    %c0_1 = arith.constant 0 : index
    %3 = vector.load %arg2[%c0, %c0_1] : memref<32x64xf32, #tpu.memory_space<vmem>>, vector<32x64xf32>
    %c0_2 = arith.constant 0 : index
    %c0_3 = arith.constant 0 : index
    %4 = vector.load %arg4[%c0_2, %c0_3] : memref<64x128xf32, #tpu.memory_space<vmem>>, vector<64x128xf32>
    %cst = arith.constant dense<0.000000e+00> : vector<32x128xf32>
    %5 = tpu.matmul %3, %4, %cst {dimension_numbers = #tpu.dot_dimension_numbers<[1], [0], [0], [1], [0, 0, 1, 1], [], []>} : vector<32x64xf32>, vector<64x128xf32>, vector<32x128xf32> -> vector<32x128xf32>
    %c0_4 = arith.constant 0 : index
    %c0_5 = arith.constant 0 : index
    %6 = vector.load %arg6[%c0_4, %c0_5] : memref<1x128xf32, #tpu.memory_space<vmem>>, vector<1x128xf32>
    %7 = vector.broadcast %6 : vector<1x128xf32> to vector<32x128xf32>
    %8 = arith.addf %5, %7 : vector<32x128xf32>
    %c0_6 = arith.constant 0 : index
    %c0_7 = arith.constant 0 : index
    %9 = vector.load %arg11[%c0_6, %c0_7] : memref<32x128xf32, #tpu.memory_space<vmem>>, vector<32x128xf32>
    tpu.vector_store %arg11[%c0_6, %c0_7], %8 {strides = array<i32>} : memref<32x128xf32, #tpu.memory_space<vmem>>, vector<32x128xf32>,
    %10 = tpu.iota {dimensions = array<i32: 0>} : vector<8x128xi32>
    %c0_i32_8 = arith.constant 0 : i32
    %c4_i32 = arith.constant 4 : i32
    %11 = arith.muli %arg0, %c4_i32 : i32
    %12 = arith.addi %11, %c0_i32_8 : i32
    %13 = arith.index_cast %12 : i32 to index
    %14 = memref.load %arg1[%13] : memref<8xi32, #tpu.memory_space<smem>>
    %c1_i32 = arith.constant 1 : i32
    %15 = arith.subi %12, %c1_i32 : i32
    %c0_i32_9 = arith.constant 0 : i32
    %c7_i32 = arith.constant 7 : i32
    %16 = arith.maxsi %c0_i32_9, %15 : i32
    %17 = arith.minsi %c7_i32, %16 : i32
    %18 = arith.index_cast %17 : i32 to index
    %19 = memref.load %arg1[%18] : memref<8xi32, #tpu.memory_space<smem>>
    %20 = vector.broadcast %19 : i32 to vector<8x128xi32>
    %21 = arith.cmpi slt, %10, %20 : vector<8x128xi32>
    %c0_10 = arith.constant 0 : index
    %c0_11 = arith.constant 0 : index
    %22 = vector.load %arg9[%c0_10, %c0_11] : memref<8x128xf32, #tpu.memory_space<vmem>>, vector<8x128xf32>
    %c0_12 = arith.constant 0 : index
    %c0_13 = arith.constant 0 : index
    %23 = vector.load %arg10[%c0_12, %c0_13] : memref<8x128xf32, #tpu.memory_space<vmem>>, vector<8x128xf32>
    %24 = arith.select %21, %22, %23 : vector<8x128xi1>, vector<8x128xf32>
    %c8_i32 = arith.constant 8 : i32
    %25 = arith.muli %c0_i32_8, %c8_i32 : i32
    %26 = tpu.assume_multiple %25, 8 : i32
    %27 = arith.index_cast %26 : i32 to index
    %c0_14 = arith.constant 0 : index
    %28 = vector.load %arg11[%27, %c0_14] : memref<32x128xf32, #tpu.memory_space<vmem>>, vector<8x128xf32>
    %c0_15 = arith.constant 0 : index
    %c0_16 = arith.constant 0 : index
    %29 = vector.load %arg5[%c0_15, %c0_16] : memref<128x128xf32, #tpu.memory_space<vmem>>, vector<128x128xf32>
    %cst_17 = arith.constant dense<0.000000e+00> : vector<8x128xf32>
    %30 = tpu.matmul %24, %29, %cst_17 {dimension_numbers = #tpu.dot_dimension_numbers<[1], [0], [0], [1], [0, 0, 1, 1], [], []>} : vector<8x128xf32>, vector<128x128xf32>, vector<8x128xf32> -> vector<8x128xf32>
    %31 = arith.addf %28, %30 : vector<8x128xf32>
    %32 = math.tanh %31 : vector<8x128xf32>
    %33 = vector.broadcast %14 : i32 to vector<8x128xi32>
    %34 = arith.cmpi slt, %10, %33 : vector<8x128xi32>
    %c0_18 = arith.constant 0 : index
    %c0_19 = arith.constant 0 : index
    %35 = vector.load %arg9[%c0_18, %c0_19] : memref<8x128xf32, #tpu.memory_space<vmem>>, vector<8x128xf32>
    %36 = arith.select %34, %32, %35 : vector<8x128xi1>, vector<8x128xf32>
    %c0_20 = arith.constant 0 : index
    %c0_21 = arith.constant 0 : index
    %37 = vector.load %arg9[%c0_20, %c0_21] : memref<8x128xf32, #tpu.memory_space<vmem>>, vector<8x128xf32>
    tpu.vector_store %arg9[%c0_20, %c0_21], %36 {strides = array<i32>} : memref<8x128xf32, #tpu.memory_space<vmem>>, vector<8x128xf32>,
    %38 = arith.index_cast %26 : i32 to index
    %c0_22 = arith.constant 0 : index
    %39 = vector.load %arg7[%38, %c0_22] : memref<32x128xf32, #tpu.memory_space<vmem>>, vector<8x128xf32>
    tpu.vector_store %arg7[%38, %c0_22], %32 {strides = array<i32>} : memref<32x128xf32, #tpu.memory_space<vmem>>, vector<8x128xf32>,
    %c1_i32_23 = arith.constant 1 : i32
    %c4_i32_24 = arith.constant 4 : i32
    %40 = arith.muli %arg0, %c4_i32_24 : i32
    %41 = arith.addi %40, %c1_i32_23 : i32
    %42 = arith.index_cast %41 : i32 to index
    %43 = memref.load %arg1[%42] : memref<8xi32, #tpu.memory_space<smem>>
    %c1_i32_25 = arith.constant 1 : i32
    %44 = arith.subi %41, %c1_i32_25 : i32
    %c0_i32_26 = arith.constant 0 : i32
    %c7_i32_27 = arith.constant 7 : i32
    %45 = arith.maxsi %c0_i32_26, %44 : i32
    %46 = arith.minsi %c7_i32_27, %45 : i32
    %47 = arith.index_cast %46 : i32 to index
    %48 = memref.load %arg1[%47] : memref<8xi32, #tpu.memory_space<smem>>
    %49 = vector.broadcast %48 : i32 to vector<8x128xi32>
    %50 = arith.cmpi slt, %10, %49 : vector<8x128xi32>
    %c0_28 = arith.constant 0 : index
    %c0_29 = arith.constant 0 : index
    %51 = vector.load %arg9[%c0_28, %c0_29] : memref<8x128xf32, #tpu.memory_space<vmem>>, vector<8x128xf32>
    %c0_30 = arith.constant 0 : index
    %c0_31 = arith.constant 0 : index
    %52 = vector.load %arg10[%c0_30, %c0_31] : memref<8x128xf32, #tpu.memory_space<vmem>>, vector<8x128xf32>
    %53 = arith.select %50, %51, %52 : vector<8x128xi1>, vector<8x128xf32>
    %c8_i32_32 = arith.constant 8 : i32
    %54 = arith.muli %c1_i32_23, %c8_i32_32 : i32
    %55 = tpu.assume_multiple %54, 8 : i32
    %56 = arith.index_cast %55 : i32 to index
    %c0_33 = arith.constant 0 : index
    %57 = vector.load %arg11[%56, %c0_33] : memref<32x128xf32, #tpu.memory_space<vmem>>, vector<8x128xf32>
    %c0_34 = arith.constant 0 : index
    %c0_35 = arith.constant 0 : index
    %58 = vector.load %arg5[%c0_34, %c0_35] : memref<128x128xf32, #tpu.memory_space<vmem>>, vector<128x128xf32>
    %cst_36 = arith.constant dense<0.000000e+00> : vector<8x128xf32>
    %59 = tpu.matmul %53, %58, %cst_36 {dimension_numbers = #tpu.dot_dimension_numbers<[1], [0], [0], [1], [0, 0, 1, 1], [], []>} : vector<8x128xf32>, vector<128x128xf32>, vector<8x128xf32> -> vector<8x128xf32>
    %60 = arith.addf %57, %59 : vector<8x128xf32>
    %61 = math.tanh %60 : vector<8x128xf32>
    %62 = vector.broadcast %43 : i32 to vector<8x128xi32>
    %63 = arith.cmpi slt, %10, %62 : vector<8x128xi32>
    %c0_37 = arith.constant 0 : index
    %c0_38 = arith.constant 0 : index
    %64 = vector.load %arg9[%c0_37, %c0_38] : memref<8x128xf32, #tpu.memory_space<vmem>>, vector<8x128xf32>
    %65 = arith.select %63, %61, %64 : vector<8x128xi1>, vector<8x128xf32>
    %c0_39 = arith.constant 0 : index
    %c0_40 = arith.constant 0 : index
    %66 = vector.load %arg9[%c0_39, %c0_40] : memref<8x128xf32, #tpu.memory_space<vmem>>, vector<8x128xf32>
    tpu.vector_store %arg9[%c0_39, %c0_40], %65 {strides = array<i32>} : memref<8x128xf32, #tpu.memory_space<vmem>>, vector<8x128xf32>,
    %67 = arith.index_cast %55 : i32 to index
    %c0_41 = arith.constant 0 : index
    %68 = vector.load %arg7[%67, %c0_41] : memref<32x128xf32, #tpu.memory_space<vmem>>, vector<8x128xf32>
    tpu.vector_store %arg7[%67, %c0_41], %61 {strides = array<i32>} : memref<32x128xf32, #tpu.memory_space<vmem>>, vector<8x128xf32>,
    %c2_i32 = arith.constant 2 : i32
    %c4_i32_42 = arith.constant 4 : i32
    %69 = arith.muli %arg0, %c4_i32_42 : i32
    %70 = arith.addi %69, %c2_i32 : i32
    %71 = arith.index_cast %70 : i32 to index
    %72 = memref.load %arg1[%71] : memref<8xi32, #tpu.memory_space<smem>>
    %c1_i32_43 = arith.constant 1 : i32
    %73 = arith.subi %70, %c1_i32_43 : i32
    %c0_i32_44 = arith.constant 0 : i32
    %c7_i32_45 = arith.constant 7 : i32
    %74 = arith.maxsi %c0_i32_44, %73 : i32
    %75 = arith.minsi %c7_i32_45, %74 : i32
    %76 = arith.index_cast %75 : i32 to index
    %77 = memref.load %arg1[%76] : memref<8xi32, #tpu.memory_space<smem>>
    %78 = vector.broadcast %77 : i32 to vector<8x128xi32>
    %79 = arith.cmpi slt, %10, %78 : vector<8x128xi32>
    %c0_46 = arith.constant 0 : index
    %c0_47 = arith.constant 0 : index
    %80 = vector.load %arg9[%c0_46, %c0_47] : memref<8x128xf32, #tpu.memory_space<vmem>>, vector<8x128xf32>
    %c0_48 = arith.constant 0 : index
    %c0_49 = arith.constant 0 : index
    %81 = vector.load %arg10[%c0_48, %c0_49] : memref<8x128xf32, #tpu.memory_space<vmem>>, vector<8x128xf32>
    %82 = arith.select %79, %80, %81 : vector<8x128xi1>, vector<8x128xf32>
    %c8_i32_50 = arith.constant 8 : i32
    %83 = arith.muli %c2_i32, %c8_i32_50 : i32
    %84 = tpu.assume_multiple %83, 8 : i32
    %85 = arith.index_cast %84 : i32 to index
    %c0_51 = arith.constant 0 : index
    %86 = vector.load %arg11[%85, %c0_51] : memref<32x128xf32, #tpu.memory_space<vmem>>, vector<8x128xf32>
    %c0_52 = arith.constant 0 : index
    %c0_53 = arith.constant 0 : index
    %87 = vector.load %arg5[%c0_52, %c0_53] : memref<128x128xf32, #tpu.memory_space<vmem>>, vector<128x128xf32>
    %cst_54 = arith.constant dense<0.000000e+00> : vector<8x128xf32>
    %88 = tpu.matmul %82, %87, %cst_54 {dimension_numbers = #tpu.dot_dimension_numbers<[1], [0], [0], [1], [0, 0, 1, 1], [], []>} : vector<8x128xf32>, vector<128x128xf32>, vector<8x128xf32> -> vector<8x128xf32>
    %89 = arith.addf %86, %88 : vector<8x128xf32>
    %90 = math.tanh %89 : vector<8x128xf32>
    %91 = vector.broadcast %72 : i32 to vector<8x128xi32>
    %92 = arith.cmpi slt, %10, %91 : vector<8x128xi32>
    %c0_55 = arith.constant 0 : index
    %c0_56 = arith.constant 0 : index
    %93 = vector.load %arg9[%c0_55, %c0_56] : memref<8x128xf32, #tpu.memory_space<vmem>>, vector<8x128xf32>
    %94 = arith.select %92, %90, %93 : vector<8x128xi1>, vector<8x128xf32>
    %c0_57 = arith.constant 0 : index
    %c0_58 = arith.constant 0 : index
    %95 = vector.load %arg9[%c0_57, %c0_58] : memref<8x128xf32, #tpu.memory_space<vmem>>, vector<8x128xf32>
    tpu.vector_store %arg9[%c0_57, %c0_58], %94 {strides = array<i32>} : memref<8x128xf32, #tpu.memory_space<vmem>>, vector<8x128xf32>,
    %96 = arith.index_cast %84 : i32 to index
    %c0_59 = arith.constant 0 : index
    %97 = vector.load %arg7[%96, %c0_59] : memref<32x128xf32, #tpu.memory_space<vmem>>, vector<8x128xf32>
    tpu.vector_store %arg7[%96, %c0_59], %90 {strides = array<i32>} : memref<32x128xf32, #tpu.memory_space<vmem>>, vector<8x128xf32>,
    %c3_i32 = arith.constant 3 : i32
    %c4_i32_60 = arith.constant 4 : i32
    %98 = arith.muli %arg0, %c4_i32_60 : i32
    %99 = arith.addi %98, %c3_i32 : i32
    %100 = arith.index_cast %99 : i32 to index
    %101 = memref.load %arg1[%100] : memref<8xi32, #tpu.memory_space<smem>>
    %c1_i32_61 = arith.constant 1 : i32
    %102 = arith.subi %99, %c1_i32_61 : i32
    %c0_i32_62 = arith.constant 0 : i32
    %c7_i32_63 = arith.constant 7 : i32
    %103 = arith.maxsi %c0_i32_62, %102 : i32
    %104 = arith.minsi %c7_i32_63, %103 : i32
    %105 = arith.index_cast %104 : i32 to index
    %106 = memref.load %arg1[%105] : memref<8xi32, #tpu.memory_space<smem>>
    %107 = vector.broadcast %106 : i32 to vector<8x128xi32>
    %108 = arith.cmpi slt, %10, %107 : vector<8x128xi32>
    %c0_64 = arith.constant 0 : index
    %c0_65 = arith.constant 0 : index
    %109 = vector.load %arg9[%c0_64, %c0_65] : memref<8x128xf32, #tpu.memory_space<vmem>>, vector<8x128xf32>
    %c0_66 = arith.constant 0 : index
    %c0_67 = arith.constant 0 : index
    %110 = vector.load %arg10[%c0_66, %c0_67] : memref<8x128xf32, #tpu.memory_space<vmem>>, vector<8x128xf32>
    %111 = arith.select %108, %109, %110 : vector<8x128xi1>, vector<8x128xf32>
    %c8_i32_68 = arith.constant 8 : i32
    %112 = arith.muli %c3_i32, %c8_i32_68 : i32
    %113 = tpu.assume_multiple %112, 8 : i32
    %114 = arith.index_cast %113 : i32 to index
    %c0_69 = arith.constant 0 : index
    %115 = vector.load %arg11[%114, %c0_69] : memref<32x128xf32, #tpu.memory_space<vmem>>, vector<8x128xf32>
    %c0_70 = arith.constant 0 : index
    %c0_71 = arith.constant 0 : index
    %116 = vector.load %arg5[%c0_70, %c0_71] : memref<128x128xf32, #tpu.memory_space<vmem>>, vector<128x128xf32>
    %cst_72 = arith.constant dense<0.000000e+00> : vector<8x128xf32>
    %117 = tpu.matmul %111, %116, %cst_72 {dimension_numbers = #tpu.dot_dimension_numbers<[1], [0], [0], [1], [0, 0, 1, 1], [], []>} : vector<8x128xf32>, vector<128x128xf32>, vector<8x128xf32> -> vector<8x128xf32>
    %118 = arith.addf %115, %117 : vector<8x128xf32>
    %119 = math.tanh %118 : vector<8x128xf32>
    %120 = vector.broadcast %101 : i32 to vector<8x128xi32>
    %121 = arith.cmpi slt, %10, %120 : vector<8x128xi32>
    %c0_73 = arith.constant 0 : index
    %c0_74 = arith.constant 0 : index
    %122 = vector.load %arg9[%c0_73, %c0_74] : memref<8x128xf32, #tpu.memory_space<vmem>>, vector<8x128xf32>
    %123 = arith.select %121, %119, %122 : vector<8x128xi1>, vector<8x128xf32>
    %c0_75 = arith.constant 0 : index
    %c0_76 = arith.constant 0 : index
    %124 = vector.load %arg9[%c0_75, %c0_76] : memref<8x128xf32, #tpu.memory_space<vmem>>, vector<8x128xf32>
    tpu.vector_store %arg9[%c0_75, %c0_76], %123 {strides = array<i32>} : memref<8x128xf32, #tpu.memory_space<vmem>>, vector<8x128xf32>,
    %125 = arith.index_cast %113 : i32 to index
    %c0_77 = arith.constant 0 : index
    %126 = vector.load %arg7[%125, %c0_77] : memref<32x128xf32, #tpu.memory_space<vmem>>, vector<8x128xf32>
    tpu.vector_store %arg7[%125, %c0_77], %119 {strides = array<i32>} : memref<32x128xf32, #tpu.memory_space<vmem>>, vector<8x128xf32>,
    %c4_i32_78 = arith.constant 4 : i32
    %c1_i32_79 = arith.constant 1 : i32
    %127 = arith.cmpi eq, %arg0, %c1_i32_79 : i32
    %128 = arith.extui %127 : i1 to i32
    %c0_i32_80 = arith.constant 0 : i32
    %129 = arith.cmpi ne, %128, %c0_i32_80 : i32
    scf.if %129 {
      %c0_81 = arith.constant 0 : index
      %c0_82 = arith.constant 0 : index
      %130 = vector.load %arg9[%c0_81, %c0_82] : memref<8x128xf32, #tpu.memory_space<vmem>>, vector<8x128xf32>
      %c0_83 = arith.constant 0 : index
      %c0_84 = arith.constant 0 : index
      %131 = vector.load %arg8[%c0_83, %c0_84] : memref<8x128xf32, #tpu.memory_space<vmem>>, vector<8x128xf32>
      tpu.vector_store %arg8[%c0_83, %c0_84], %130 {strides = array<i32>} : memref<8x128xf32, #tpu.memory_space<vmem>>, vector<8x128xf32>,
    } else {
    }
    return
  }
  func.func @transform_0(%arg0: i32, %arg1: memref<8xi32, #tpu.memory_space<smem>>) -> (i32, i32) {
    %c0_i32 = arith.constant 0 : i32
    %c0_i32_0 = arith.constant 0 : i32
    return %arg0, %c0_i32 : i32, i32
  }
  func.func @transform_1(%arg0: i32, %arg1: memref<8xi32, #tpu.memory_space<smem>>) -> (i32, i32) {
    %c0_i32 = arith.constant 0 : i32
    %c0_i32_0 = arith.constant 0 : i32
    %c0_i32_1 = arith.constant 0 : i32
    return %c0_i32, %c0_i32_0 : i32, i32
  }
  func.func @transform_2(%arg0: i32, %arg1: memref<8xi32, #tpu.memory_space<smem>>) -> (i32, i32) {
    %c0_i32 = arith.constant 0 : i32
    %c0_i32_0 = arith.constant 0 : i32
    %c0_i32_1 = arith.constant 0 : i32
    return %c0_i32, %c0_i32_0 : i32, i32
  }
  func.func @transform_3(%arg0: i32, %arg1: memref<8xi32, #tpu.memory_space<smem>>) -> (i32, i32) {
    %c0_i32 = arith.constant 0 : i32
    %c0_i32_0 = arith.constant 0 : i32
    %c0_i32_1 = arith.constant 0 : i32
    return %c0_i32, %c0_i32_0 : i32, i32
  }
  func.func @transform_4(%arg0: i32, %arg1: memref<8xi32, #tpu.memory_space<smem>>) -> (i32, i32) {
    %c0_i32 = arith.constant 0 : i32
    %c0_i32_0 = arith.constant 0 : i32
    %c0_i32_1 = arith.constant 0 : i32
    return %c0_i32, %c0_i32_0 : i32, i32
  }
  func.func @transform_5(%arg0: i32, %arg1: memref<8xi32, #tpu.memory_space<smem>>) -> (i32, i32) {
    %c0_i32 = arith.constant 0 : i32
    %c0_i32_0 = arith.constant 0 : i32
    return %arg0, %c0_i32 : i32, i32
  }
  func.func @transform_6(%arg0: i32, %arg1: memref<8xi32, #tpu.memory_space<smem>>) -> (i32, i32) {
    %c0_i32 = arith.constant 0 : i32
    %c0_i32_0 = arith.constant 0 : i32
    %c0_i32_1 = arith.constant 0 : i32
    return %c0_i32, %c0_i32_0 : i32, i32
  }
}

module attributes {stable_mosaic.version = 11 : i64} {
  func.func @kernel(%arg0: i32, %arg1: memref<8xi32, #tpu.memory_space<smem>>, %arg2: memref<32x64xf32, #tpu.memory_space<vmem>>, %arg3: memref<8x128xf32, #tpu.memory_space<vmem>>, %arg4: memref<64x128xf32, #tpu.memory_space<vmem>>, %arg5: memref<128x128xf32, #tpu.memory_space<vmem>>, %arg6: memref<1x128xf32, #tpu.memory_space<vmem>>, %arg7: memref<32x128xf32, #tpu.memory_space<vmem>>, %arg8: memref<8x128xf32, #tpu.memory_space<vmem>>, %arg9: memref<8x128xf32, #tpu.memory_space<vmem>>, %arg10: memref<8x128xf32, #tpu.memory_space<vmem>>, %arg11: memref<32x128xf32, #tpu.memory_space<vmem>>) attributes {dimension_semantics = [#tpu.dimension_semantics<arbitrary>], iteration_bounds = array<i64: 2>, scalar_prefetch = 1 : i64, scratch_operands = 3 : i64, tpu.core_type = #tpu.core_type<tc>, window_params = [{transform_indices = @transform_0, window_bounds = array<i64: 32, 64>}, {pipeline_mode = #tpu.pipeline_mode<synchronous>, transform_indices = @transform_1, window_bounds = array<i64: 8, 128>}, {pipeline_mode = #tpu.pipeline_mode<synchronous>, transform_indices = @transform_2, window_bounds = array<i64: 64, 128>}, {pipeline_mode = #tpu.pipeline_mode<synchronous>, transform_indices = @transform_3, window_bounds = array<i64: 128, 128>}, {pipeline_mode = #tpu.pipeline_mode<synchronous>, transform_indices = @transform_4, window_bounds = array<i64: 1, 128>}, {transform_indices = @transform_5, window_bounds = array<i64: 32, 128>}, {pipeline_mode = #tpu.pipeline_mode<synchronous>, transform_indices = @transform_6, window_bounds = array<i64: 8, 128>}]} {
    %c0_i32 = arith.constant 0 : i32
    %0 = arith.cmpi eq, %arg0, %c0_i32 : i32
    %1 = arith.extui %0 : i1 to i32
    %c0_i32_0 = arith.constant 0 : i32
    %2 = arith.cmpi ne, %1, %c0_i32_0 : i32
    scf.if %2 {
      %c0_81 = arith.constant 0 : index
      %c0_82 = arith.constant 0 : index
      %130 = vector.load %arg3[%c0_81, %c0_82] : memref<8x128xf32, #tpu.memory_space<vmem>>, vector<8x128xf32>
      %c0_83 = arith.constant 0 : index
      %c0_84 = arith.constant 0 : index
      %131 = vector.load %arg9[%c0_83, %c0_84] : memref<8x128xf32, #tpu.memory_space<vmem>>, vector<8x128xf32>
      tpu.vector_store %arg9[%c0_83, %c0_84], %130 {strides = array<i32>} : memref<8x128xf32, #tpu.memory_space<vmem>>, vector<8x128xf32>,
      %c0_85 = arith.constant 0 : index
      %c0_86 = arith.constant 0 : index
      %132 = vector.load %arg10[%c0_85, %c0_86] : memref<8x128xf32, #tpu.memory_space<vmem>>, vector<8x128xf32>
      tpu.vector_store %arg10[%c0_85, %c0_86], %130 {strides = array<i32>} : memref<8x128xf32, #tpu.memory_space<vmem>>, vector<8x128xf32>,
    } else {
    }
    %c0 = arith.constant 0 : index
    %c0_1 = arith.constant 0 : index
    %3 = vector.load %arg2[%c0, %c0_1] : memref<32x64xf32, #tpu.memory_space<vmem>>, vector<32x64xf32>
    %c0_2 = arith.constant 0 : index
    %c0_3 = arith.constant 0 : index
    %4 = vector.load %arg4[%c0_2, %c0_3] : memref<64x128xf32, #tpu.memory_space<vmem>>, vector<64x128xf32>
    %cst = arith.constant dense<0.000000e+00> : vector<32x128xf32>
    %5 = tpu.matmul %3, %4, %cst {dimension_numbers = #tpu.dot_dimension_numbers<[1], [0], [0], [1], [0, 0, 1, 1], [], []>} : vector<32x64xf32>, vector<64x128xf32>, vector<32x128xf32> -> vector<32x128xf32>
    %c0_4 = arith.constant 0 : index
    %c0_5 = arith.constant 0 : index
    %6 = vector.load %arg6[%c0_4, %c0_5] : memref<1x128xf32, #tpu.memory_space<vmem>>, vector<1x128xf32>
    %7 = vector.broadcast %6 : vector<1x128xf32> to vector<32x128xf32>
    %8 = arith.addf %5, %7 : vector<32x128xf32>
    %c0_6 = arith.constant 0 : index
    %c0_7 = arith.constant 0 : index
    %9 = vector.load %arg11[%c0_6, %c0_7] : memref<32x128xf32, #tpu.memory_space<vmem>>, vector<32x128xf32>
    tpu.vector_store %arg11[%c0_6, %c0_7], %8 {strides = array<i32>} : memref<32x128xf32, #tpu.memory_space<vmem>>, vector<32x128xf32>,
    %10 = tpu.iota {dimensions = array<i32: 0>} : vector<8x128xi32>
    %c0_i32_8 = arith.constant 0 : i32
    %c4_i32 = arith.constant 4 : i32
    %11 = arith.muli %arg0, %c4_i32 : i32
    %12 = arith.addi %11, %c0_i32_8 : i32
    %13 = arith.index_cast %12 : i32 to index
    %14 = memref.load %arg1[%13] : memref<8xi32, #tpu.memory_space<smem>>
    %c1_i32 = arith.constant 1 : i32
    %15 = arith.subi %12, %c1_i32 : i32
    %c0_i32_9 = arith.constant 0 : i32
    %c7_i32 = arith.constant 7 : i32
    %16 = arith.maxsi %c0_i32_9, %15 : i32
    %17 = arith.minsi %c7_i32, %16 : i32
    %18 = arith.index_cast %17 : i32 to index
    %19 = memref.load %arg1[%18] : memref<8xi32, #tpu.memory_space<smem>>
    %20 = vector.broadcast %19 : i32 to vector<8x128xi32>
    %21 = arith.cmpi slt, %10, %20 : vector<8x128xi32>
    %c0_10 = arith.constant 0 : index
    %c0_11 = arith.constant 0 : index
    %22 = vector.load %arg9[%c0_10, %c0_11] : memref<8x128xf32, #tpu.memory_space<vmem>>, vector<8x128xf32>
    %c0_12 = arith.constant 0 : index
    %c0_13 = arith.constant 0 : index
    %23 = vector.load %arg10[%c0_12, %c0_13] : memref<8x128xf32, #tpu.memory_space<vmem>>, vector<8x128xf32>
    %24 = arith.select %21, %22, %23 : vector<8x128xi1>, vector<8x128xf32>
    %c8_i32 = arith.constant 8 : i32
    %25 = arith.muli %c0_i32_8, %c8_i32 : i32
    %26 = tpu.assume_multiple %25, 8 : i32
    %27 = arith.index_cast %26 : i32 to index
    %c0_14 = arith.constant 0 : index
    %28 = vector.load %arg11[%27, %c0_14] : memref<32x128xf32, #tpu.memory_space<vmem>>, vector<8x128xf32>
    %c0_15 = arith.constant 0 : index
    %c0_16 = arith.constant 0 : index
    %29 = vector.load %arg5[%c0_15, %c0_16] : memref<128x128xf32, #tpu.memory_space<vmem>>, vector<128x128xf32>
    %cst_17 = arith.constant dense<0.000000e+00> : vector<8x128xf32>
    %30 = tpu.matmul %24, %29, %cst_17 {dimension_numbers = #tpu.dot_dimension_numbers<[1], [0], [0], [1], [0, 0, 1, 1], [], []>} : vector<8x128xf32>, vector<128x128xf32>, vector<8x128xf32> -> vector<8x128xf32>
    %31 = arith.addf %28, %30 : vector<8x128xf32>
    %32 = math.tanh %31 : vector<8x128xf32>
    %33 = vector.broadcast %14 : i32 to vector<8x128xi32>
    %34 = arith.cmpi slt, %10, %33 : vector<8x128xi32>
    %c0_18 = arith.constant 0 : index
    %c0_19 = arith.constant 0 : index
    %35 = vector.load %arg9[%c0_18, %c0_19] : memref<8x128xf32, #tpu.memory_space<vmem>>, vector<8x128xf32>
    %36 = arith.select %34, %32, %35 : vector<8x128xi1>, vector<8x128xf32>
    %c0_20 = arith.constant 0 : index
    %c0_21 = arith.constant 0 : index
    %37 = vector.load %arg9[%c0_20, %c0_21] : memref<8x128xf32, #tpu.memory_space<vmem>>, vector<8x128xf32>
    tpu.vector_store %arg9[%c0_20, %c0_21], %36 {strides = array<i32>} : memref<8x128xf32, #tpu.memory_space<vmem>>, vector<8x128xf32>,
    %38 = arith.index_cast %26 : i32 to index
    %c0_22 = arith.constant 0 : index
    %39 = vector.load %arg7[%38, %c0_22] : memref<32x128xf32, #tpu.memory_space<vmem>>, vector<8x128xf32>
    tpu.vector_store %arg7[%38, %c0_22], %32 {strides = array<i32>} : memref<32x128xf32, #tpu.memory_space<vmem>>, vector<8x128xf32>,
    %c1_i32_23 = arith.constant 1 : i32
    %c4_i32_24 = arith.constant 4 : i32
    %40 = arith.muli %arg0, %c4_i32_24 : i32
    %41 = arith.addi %40, %c1_i32_23 : i32
    %42 = arith.index_cast %41 : i32 to index
    %43 = memref.load %arg1[%42] : memref<8xi32, #tpu.memory_space<smem>>
    %c1_i32_25 = arith.constant 1 : i32
    %44 = arith.subi %41, %c1_i32_25 : i32
    %c0_i32_26 = arith.constant 0 : i32
    %c7_i32_27 = arith.constant 7 : i32
    %45 = arith.maxsi %c0_i32_26, %44 : i32
    %46 = arith.minsi %c7_i32_27, %45 : i32
    %47 = arith.index_cast %46 : i32 to index
    %48 = memref.load %arg1[%47] : memref<8xi32, #tpu.memory_space<smem>>
    %49 = vector.broadcast %48 : i32 to vector<8x128xi32>
    %50 = arith.cmpi slt, %10, %49 : vector<8x128xi32>
    %c0_28 = arith.constant 0 : index
    %c0_29 = arith.constant 0 : index
    %51 = vector.load %arg9[%c0_28, %c0_29] : memref<8x128xf32, #tpu.memory_space<vmem>>, vector<8x128xf32>
    %c0_30 = arith.constant 0 : index
    %c0_31 = arith.constant 0 : index
    %52 = vector.load %arg10[%c0_30, %c0_31] : memref<8x128xf32, #tpu.memory_space<vmem>>, vector<8x128xf32>
    %53 = arith.select %50, %51, %52 : vector<8x128xi1>, vector<8x128xf32>
    %c8_i32_32 = arith.constant 8 : i32
    %54 = arith.muli %c1_i32_23, %c8_i32_32 : i32
    %55 = tpu.assume_multiple %54, 8 : i32
    %56 = arith.index_cast %55 : i32 to index
    %c0_33 = arith.constant 0 : index
    %57 = vector.load %arg11[%56, %c0_33] : memref<32x128xf32, #tpu.memory_space<vmem>>, vector<8x128xf32>
    %c0_34 = arith.constant 0 : index
    %c0_35 = arith.constant 0 : index
    %58 = vector.load %arg5[%c0_34, %c0_35] : memref<128x128xf32, #tpu.memory_space<vmem>>, vector<128x128xf32>
    %cst_36 = arith.constant dense<0.000000e+00> : vector<8x128xf32>
    %59 = tpu.matmul %53, %58, %cst_36 {dimension_numbers = #tpu.dot_dimension_numbers<[1], [0], [0], [1], [0, 0, 1, 1], [], []>} : vector<8x128xf32>, vector<128x128xf32>, vector<8x128xf32> -> vector<8x128xf32>
    %60 = arith.addf %57, %59 : vector<8x128xf32>
    %61 = math.tanh %60 : vector<8x128xf32>
    %62 = vector.broadcast %43 : i32 to vector<8x128xi32>
    %63 = arith.cmpi slt, %10, %62 : vector<8x128xi32>
    %c0_37 = arith.constant 0 : index
    %c0_38 = arith.constant 0 : index
    %64 = vector.load %arg9[%c0_37, %c0_38] : memref<8x128xf32, #tpu.memory_space<vmem>>, vector<8x128xf32>
    %65 = arith.select %63, %61, %64 : vector<8x128xi1>, vector<8x128xf32>
    %c0_39 = arith.constant 0 : index
    %c0_40 = arith.constant 0 : index
    %66 = vector.load %arg9[%c0_39, %c0_40] : memref<8x128xf32, #tpu.memory_space<vmem>>, vector<8x128xf32>
    tpu.vector_store %arg9[%c0_39, %c0_40], %65 {strides = array<i32>} : memref<8x128xf32, #tpu.memory_space<vmem>>, vector<8x128xf32>,
    %67 = arith.index_cast %55 : i32 to index
    %c0_41 = arith.constant 0 : index
    %68 = vector.load %arg7[%67, %c0_41] : memref<32x128xf32, #tpu.memory_space<vmem>>, vector<8x128xf32>
    tpu.vector_store %arg7[%67, %c0_41], %61 {strides = array<i32>} : memref<32x128xf32, #tpu.memory_space<vmem>>, vector<8x128xf32>,
    %c2_i32 = arith.constant 2 : i32
    %c4_i32_42 = arith.constant 4 : i32
    %69 = arith.muli %arg0, %c4_i32_42 : i32
    %70 = arith.addi %69, %c2_i32 : i32
    %71 = arith.index_cast %70 : i32 to index
    %72 = memref.load %arg1[%71] : memref<8xi32, #tpu.memory_space<smem>>
    %c1_i32_43 = arith.constant 1 : i32
    %73 = arith.subi %70, %c1_i32_43 : i32
    %c0_i32_44 = arith.constant 0 : i32
    %c7_i32_45 = arith.constant 7 : i32
    %74 = arith.maxsi %c0_i32_44, %73 : i32
    %75 = arith.minsi %c7_i32_45, %74 : i32
    %76 = arith.index_cast %75 : i32 to index
    %77 = memref.load %arg1[%76] : memref<8xi32, #tpu.memory_space<smem>>
    %78 = vector.broadcast %77 : i32 to vector<8x128xi32>
    %79 = arith.cmpi slt, %10, %78 : vector<8x128xi32>
    %c0_46 = arith.constant 0 : index
    %c0_47 = arith.constant 0 : index
    %80 = vector.load %arg9[%c0_46, %c0_47] : memref<8x128xf32, #tpu.memory_space<vmem>>, vector<8x128xf32>
    %c0_48 = arith.constant 0 : index
    %c0_49 = arith.constant 0 : index
    %81 = vector.load %arg10[%c0_48, %c0_49] : memref<8x128xf32, #tpu.memory_space<vmem>>, vector<8x128xf32>
    %82 = arith.select %79, %80, %81 : vector<8x128xi1>, vector<8x128xf32>
    %c8_i32_50 = arith.constant 8 : i32
    %83 = arith.muli %c2_i32, %c8_i32_50 : i32
    %84 = tpu.assume_multiple %83, 8 : i32
    %85 = arith.index_cast %84 : i32 to index
    %c0_51 = arith.constant 0 : index
    %86 = vector.load %arg11[%85, %c0_51] : memref<32x128xf32, #tpu.memory_space<vmem>>, vector<8x128xf32>
    %c0_52 = arith.constant 0 : index
    %c0_53 = arith.constant 0 : index
    %87 = vector.load %arg5[%c0_52, %c0_53] : memref<128x128xf32, #tpu.memory_space<vmem>>, vector<128x128xf32>
    %cst_54 = arith.constant dense<0.000000e+00> : vector<8x128xf32>
    %88 = tpu.matmul %82, %87, %cst_54 {dimension_numbers = #tpu.dot_dimension_numbers<[1], [0], [0], [1], [0, 0, 1, 1], [], []>} : vector<8x128xf32>, vector<128x128xf32>, vector<8x128xf32> -> vector<8x128xf32>
    %89 = arith.addf %86, %88 : vector<8x128xf32>
    %90 = math.tanh %89 : vector<8x128xf32>
    %91 = vector.broadcast %72 : i32 to vector<8x128xi32>
    %92 = arith.cmpi slt, %10, %91 : vector<8x128xi32>
    %c0_55 = arith.constant 0 : index
    %c0_56 = arith.constant 0 : index
    %93 = vector.load %arg9[%c0_55, %c0_56] : memref<8x128xf32, #tpu.memory_space<vmem>>, vector<8x128xf32>
    %94 = arith.select %92, %90, %93 : vector<8x128xi1>, vector<8x128xf32>
    %c0_57 = arith.constant 0 : index
    %c0_58 = arith.constant 0 : index
    %95 = vector.load %arg9[%c0_57, %c0_58] : memref<8x128xf32, #tpu.memory_space<vmem>>, vector<8x128xf32>
    tpu.vector_store %arg9[%c0_57, %c0_58], %94 {strides = array<i32>} : memref<8x128xf32, #tpu.memory_space<vmem>>, vector<8x128xf32>,
    %96 = arith.index_cast %84 : i32 to index
    %c0_59 = arith.constant 0 : index
    %97 = vector.load %arg7[%96, %c0_59] : memref<32x128xf32, #tpu.memory_space<vmem>>, vector<8x128xf32>
    tpu.vector_store %arg7[%96, %c0_59], %90 {strides = array<i32>} : memref<32x128xf32, #tpu.memory_space<vmem>>, vector<8x128xf32>,
    %c3_i32 = arith.constant 3 : i32
    %c4_i32_60 = arith.constant 4 : i32
    %98 = arith.muli %arg0, %c4_i32_60 : i32
    %99 = arith.addi %98, %c3_i32 : i32
    %100 = arith.index_cast %99 : i32 to index
    %101 = memref.load %arg1[%100] : memref<8xi32, #tpu.memory_space<smem>>
    %c1_i32_61 = arith.constant 1 : i32
    %102 = arith.subi %99, %c1_i32_61 : i32
    %c0_i32_62 = arith.constant 0 : i32
    %c7_i32_63 = arith.constant 7 : i32
    %103 = arith.maxsi %c0_i32_62, %102 : i32
    %104 = arith.minsi %c7_i32_63, %103 : i32
    %105 = arith.index_cast %104 : i32 to index
    %106 = memref.load %arg1[%105] : memref<8xi32, #tpu.memory_space<smem>>
    %107 = vector.broadcast %106 : i32 to vector<8x128xi32>
    %108 = arith.cmpi slt, %10, %107 : vector<8x128xi32>
    %c0_64 = arith.constant 0 : index
    %c0_65 = arith.constant 0 : index
    %109 = vector.load %arg9[%c0_64, %c0_65] : memref<8x128xf32, #tpu.memory_space<vmem>>, vector<8x128xf32>
    %c0_66 = arith.constant 0 : index
    %c0_67 = arith.constant 0 : index
    %110 = vector.load %arg10[%c0_66, %c0_67] : memref<8x128xf32, #tpu.memory_space<vmem>>, vector<8x128xf32>
    %111 = arith.select %108, %109, %110 : vector<8x128xi1>, vector<8x128xf32>
    %c8_i32_68 = arith.constant 8 : i32
    %112 = arith.muli %c3_i32, %c8_i32_68 : i32
    %113 = tpu.assume_multiple %112, 8 : i32
    %114 = arith.index_cast %113 : i32 to index
    %c0_69 = arith.constant 0 : index
    %115 = vector.load %arg11[%114, %c0_69] : memref<32x128xf32, #tpu.memory_space<vmem>>, vector<8x128xf32>
    %c0_70 = arith.constant 0 : index
    %c0_71 = arith.constant 0 : index
    %116 = vector.load %arg5[%c0_70, %c0_71] : memref<128x128xf32, #tpu.memory_space<vmem>>, vector<128x128xf32>
    %cst_72 = arith.constant dense<0.000000e+00> : vector<8x128xf32>
    %117 = tpu.matmul %111, %116, %cst_72 {dimension_numbers = #tpu.dot_dimension_numbers<[1], [0], [0], [1], [0, 0, 1, 1], [], []>} : vector<8x128xf32>, vector<128x128xf32>, vector<8x128xf32> -> vector<8x128xf32>
    %118 = arith.addf %115, %117 : vector<8x128xf32>
    %119 = math.tanh %118 : vector<8x128xf32>
    %120 = vector.broadcast %101 : i32 to vector<8x128xi32>
    %121 = arith.cmpi slt, %10, %120 : vector<8x128xi32>
    %c0_73 = arith.constant 0 : index
    %c0_74 = arith.constant 0 : index
    %122 = vector.load %arg9[%c0_73, %c0_74] : memref<8x128xf32, #tpu.memory_space<vmem>>, vector<8x128xf32>
    %123 = arith.select %121, %119, %122 : vector<8x128xi1>, vector<8x128xf32>
    %c0_75 = arith.constant 0 : index
    %c0_76 = arith.constant 0 : index
    %124 = vector.load %arg9[%c0_75, %c0_76] : memref<8x128xf32, #tpu.memory_space<vmem>>, vector<8x128xf32>
    tpu.vector_store %arg9[%c0_75, %c0_76], %123 {strides = array<i32>} : memref<8x128xf32, #tpu.memory_space<vmem>>, vector<8x128xf32>,
    %125 = arith.index_cast %113 : i32 to index
    %c0_77 = arith.constant 0 : index
    %126 = vector.load %arg7[%125, %c0_77] : memref<32x128xf32, #tpu.memory_space<vmem>>, vector<8x128xf32>
    tpu.vector_store %arg7[%125, %c0_77], %119 {strides = array<i32>} : memref<32x128xf32, #tpu.memory_space<vmem>>, vector<8x128xf32>,
    %c4_i32_78 = arith.constant 4 : i32
    %c1_i32_79 = arith.constant 1 : i32
    %127 = arith.cmpi eq, %arg0, %c1_i32_79 : i32
    %128 = arith.extui %127 : i1 to i32
    %c0_i32_80 = arith.constant 0 : i32
    %129 = arith.cmpi ne, %128, %c0_i32_80 : i32
    scf.if %129 {
      %c0_81 = arith.constant 0 : index
      %c0_82 = arith.constant 0 : index
      %130 = vector.load %arg9[%c0_81, %c0_82] : memref<8x128xf32, #tpu.memory_space<vmem>>, vector<8x128xf32>
      %c0_83 = arith.constant 0 : index
      %c0_84 = arith.constant 0 : index
      %131 = vector.load %arg8[%c0_83, %c0_84] : memref<8x128xf32, #tpu.memory_space<vmem>>, vector<8x128xf32>
      tpu.vector_store %arg8[%c0_83, %c0_84], %130 {strides = array<i32>} : memref<8x128xf32, #tpu.memory_space<vmem>>, vector<8x128xf32>,
    } else {
    }
    return
  }
  func.func @transform_0(%arg0: i32, %arg1: memref<8xi32, #tpu.memory_space<smem>>) -> (i32, i32) {
    %c0_i32 = arith.constant 0 : i32
    %c0_i32_0 = arith.constant 0 : i32
    return %arg0, %c0_i32 : i32, i32
  }
  func.func @transform_1(%arg0: i32, %arg1: memref<8xi32, #tpu.memory_space<smem>>) -> (i32, i32) {
    %c0_i32 = arith.constant 0 : i32
    %c0_i32_0 = arith.constant 0 : i32
    %c0_i32_1 = arith.constant 0 : i32
    return %c0_i32, %c0_i32_0 : i32, i32
  }
  func.func @transform_2(%arg0: i32, %arg1: memref<8xi32, #tpu.memory_space<smem>>) -> (i32, i32) {
    %c0_i32 = arith.constant 0 : i32
    %c0_i32_0 = arith.constant 0 : i32
    %c0_i32_1 = arith.constant 0 : i32
    return %c0_i32, %c0_i32_0 : i32, i32
  }
  func.func @transform_3(%arg0: i32, %arg1: memref<8xi32, #tpu.memory_space<smem>>) -> (i32, i32) {
    %c0_i32 = arith.constant 0 : i32
    %c0_i32_0 = arith.constant 0 : i32
    %c0_i32_1 = arith.constant 0 : i32
    return %c0_i32, %c0_i32_0 : i32, i32
  }
  func.func @transform_4(%arg0: i32, %arg1: memref<8xi32, #tpu.memory_space<smem>>) -> (i32, i32) {
    %c0_i32 = arith.constant 0 : i32
    %c0_i32_0 = arith.constant 0 : i32
    %c0_i32_1 = arith.constant 0 : i32
    return %c0_i32, %c0_i32_0 : i32, i32
  }
  func.func @transform_5(%arg0: i32, %arg1: memref<8xi32, #tpu.memory_space<smem>>) -> (i32, i32) {
    %c0_i32 = arith.constant 0 : i32
    %c0_i32_0 = arith.constant 0 : i32
    return %arg0, %c0_i32 : i32, i32
  }
  func.func @transform_6(%arg0: i32, %arg1: memref<8xi32, #tpu.memory_space<smem>>) -> (i32, i32) {
    %c0_i32 = arith.constant 0 : i32
    %c0_i32_0 = arith.constant 0 : i32
    %c0_i32_1 = arith.constant 0 : i32
    return %c0_i32, %c0_i32_0 : i32, i32
  }
}

</mosaic_0001>

<bundles_post_ra>
// kernel: tpu_custom_call.1
= control target key start
LH: loop header
LB: loop body
LE: loop exit
PB: predicated region body
PF: predicated region fallthrough
CT: control target
= control target key end

     0   :  { %s2273_s0 = inlined_call_operand.hbm [shape: s32[8], index: 0, kind: input, shape index: {}]   ;;  %s2274_s1 = inlined_call_operand.hbm [shape: f32[64,64], index: 1, kind: input, shape index: {}]   ;;  %s2275_s2 = inlined_call_operand.hbm [shape: f32[8,128], index: 2, kind: input, shape index: {}]   ;;  %s2276_s3 = inlined_call_operand.hbm [shape: f32[64,128], index: 3, kind: input, shape index: {}]   ;;  %s2277_s4 = inlined_call_operand.hbm [shape: f32[128,128], index: 4, kind: input, shape index: {}]   ;;  %s2278_s5 = inlined_call_operand.vmem [shape: f32[1,128], index: 5, kind: input, shape index: {}]   ;;  %s2279_s6 = inlined_call_operand.hbm [shape: f32[64,128], index: 6, kind: output, shape index: {0}]   ;;  %s2280_s7 = inlined_call_operand.hbm [shape: f32[8,128], index: 7, kind: output, shape index: {1}]  }
   0x1   :  { %s1540_s26 = scalar_lea.hbm %s2273_s0, 16 }
   0x2   :  { %p1541_p0 = scmp.ne.s32.totalorder %s2273_s0, %s1540_s26  ;;  %p1544_p1 = scmp.lt.u32.totalorder %s1540_s26, %s2273_s0 }
   0x4   :  { %p1546_p2 = pnand %p1544_p1, %p1541_p0 }
   0x6   :  { %1549 = shalt.err (!%p1546_p2)  }
   0x7   :  { %s1772_s8 = smov [#allocation6]  }
   0x8   :  { %14 = dma.hbm_to_smem %s2273_s0, 16, %s1772_s8, [#allocation5] }
   0x9   :  { %1734 = dma.done.wait [#allocation5], 16 }
   0xa   :  { %1735 = vsyncadd [#allocation5], 4294967280 }
   0xb   :  { %16 = sfence }
   0xc   :  { %17 = vsyncpa [#allocation8], 0 }
   0xd   :  { %19 = vsyncpa [#allocation8 + $0x1], 0 }
   0xe   :  { %20 = vsyncpa [#allocation11], 0 }
   0xf   :  { %21 = vsyncpa [#allocation14], 0 }
  0x10   :  { %22 = vsyncpa [#allocation9], 0 }
  0x11   :  { %24 = vsyncpa [#allocation9 + $0x1], 0 }
  0x12   :  { %25 = vsyncpa [#allocation17], 0  ;;  %s1838_s11 = smov 0   ;;  %s1840_s12 = smov 0  }
  0x13   :  { %s1842_s13 = smov 0   ;;  %s1844_s14 = smov 0  }
  0x14 LB: > { %s1859_s0 = sadd.s32 4294967295, %s1770_s14   ;;  %s1023_s15 = sadd.s32 4294967294, %s1770_s14   ;;  %s1770_s14 = sphi %s1844_s14, %s2309_s14   ;;  %s1766_s13 = sphi %s1842_s13, %s2308_s13   ;;  %s1762_s12 = sphi %s1840_s12, %s2307_s12   ;;  %s1758_s11 = sphi %s1838_s11, %s2306_s11  }
  0x15   : > { %p51_p3 = scmp.ne.s32.totalorder %s1762_s12, %s1758_s11  ;;  %p2281_p4 = scmp.eq.s32.totalorder %s1859_s0, 0 }
  0x16   : > { %p165_p6 = scmp.eq.s32.totalorder %s1023_s15, 1  ;;  %p1024_p8 = scmp.ge.s32.totalorder %s1770_s14, 1 }
  0x17   : > { %p1868_p7 = por %p2281_p4, %p51_p3  ;;  %p193_p10 = scmp.lt.s32.totalorder %s1770_s14, 3 }
  0x18   : > { %p1873_p9 = por %p165_p6, %p51_p3  ;;  %s1773_s19 = smov [#allocation10]  }
  0x19   : > { %s2284_s16 = scalar_select %p1868_p7, 1, 0 }
  0x1a   : > { %s2285_s17 = scalar_select %p1873_p9, 1, 0 }
  0x1b   : > { %p1879_p12 = pnand %p1024_p8, %p193_p10  ;;  %s206_s20 = sshll.u32 %s1773_s19, 4  ;;  %s207_s20 = int_to_ptr.vmem [resolvable:$true] %s206_s20 }
  0x1c   : > { %s1774_s21 = smov [#allocation12]   ;;  %s1775_s24 = smov [#allocation13]  }
  0x1d   : > { %s2286_s18 = scalar_select %p1879_p12, 1, 0 }
  0x1e   : > { %p1460_p0 = pneg %p1879_p12  ;;  %s216_s22 = sshll.u32 %s1774_s21, 4  ;;  %s1892_s22 = int_to_ptr.vmem [resolvable:$true] %s216_s22 }
  0x1f   : > { %s1894_s25 = sshll.u32 %s1775_s24, 4  ;;  %s1550_s28 = scalar_lea.hbm %s2275_s2, 128  ;;  %s230_s25 = int_to_ptr.vmem [resolvable:$true] %s1894_s25 }
  0x20   : > { %p1888_p1 = pnand %p1460_p0, %p2281_p4  ;;  %p1551_p2 = scmp.ne.s32.totalorder %s2275_s2, %s1550_s28 }
  0x21   : > { %p1557_p10 = scmp.lt.u32.totalorder %s1550_s28, %s2275_s2 }
  0x22   : > { %p1904_p3 = pneg %p1888_p1 }
  0x24   : > { %p1553_p6 = pnand %p1904_p3, %p1551_p2 }
  0x26   : > { %p1554_p8 = pneg %p1553_p6 }
  0x28   : > { %p1559_p0 = pnand %p1557_p10, %p1554_p8 }
  0x2a   : > { %1562 = shalt.err (!%p1559_p0)
}
  0x2b   : > { %s1563_s15 = scalar_lea.vmem %s207_s20, 128  ;;  %p1571_p5 = scmp.lt.s32.totalorder %s207_s20, %s207_s20 }
  0x2c   : > { %p1564_p13 = scmp.ne.s32.totalorder %s207_s20, %s1563_s15  ;;  %p1572_p9 = scmp.lt.s32.totalorder %s1563_s15, %s1563_s15 }
  0x2e   : > { %p1566_p11 = pnand %p1564_p13, %p1904_p3  ;;  %p1573_p7 = por %p1572_p9, %p1571_p5 }
  0x30   : > { %p1567_p4 = pneg %p1566_p11 }
  0x32   : > { %p1574_p12 = pnand %p1573_p7, %p1567_p4 }
  0x34   : > { %1577 = shalt.err (!%p1574_p12)
}
  0x35   : > { %1463 = dma.hbm_to_vmem [thread:$0]  (!%p1888_p1), %s2275_s2, 128, %s207_s20, [#allocation11]  }
  0x36   : > { %s1578_s27 = scalar_lea.hbm %s2276_s3, 1024 }
  0x37   : > { %p1579_p11 = scmp.ne.s32.totalorder %s2276_s3, %s1578_s27  ;;  %p1585_p4 = scmp.lt.u32.totalorder %s1578_s27, %s2276_s3 }
  0x39   : > { %p1581_p13 = pnand %p1579_p11, %p1904_p3 }
  0x3b   : > { %p1582_p5 = pneg %p1581_p13 }
  0x3d   : > { %p1587_p7 = pnand %p1585_p4, %p1582_p5 }
  0x3f   : > { %1590 = shalt.err (!%p1587_p7)
}
  0x40   : > { %s1591_s20 = scalar_lea.vmem %s1892_s22, 1024  ;;  %p1599_p6 = scmp.lt.s32.totalorder %s1892_s22, %s1892_s22 }
  0x41   : > { %p1592_p9 = scmp.ne.s32.totalorder %s1892_s22, %s1591_s20  ;;  %p1600_p8 = scmp.lt.s32.totalorder %s1591_s20, %s1591_s20 }
  0x43   : > { %p1594_p12 = pnand %p1592_p9, %p1904_p3  ;;  %p1601_p10 = por %p1600_p8, %p1599_p6 }
  0x45   : > { %p1595_p2 = pneg %p1594_p12 }
  0x47   : > { %p1602_p0 = pnand %p1601_p10, %p1595_p2 }
  0x49   : > { %1605 = shalt.err (!%p1602_p0)
}
  0x4a   : > { %s1776_s10 = smov 128   ;;  %s1777_s15 = smov 8  }
  0x4b   : > { %1466 = dma.hbm_to_vmem [thread:$0]  (!%p1888_p1), %s2276_s3, 1024, %s1892_s22, [#allocation11], %s1776_s10, %s1776_s10, %s1777_s15  }
  0x4c   : > { %s1606_s27 = scalar_lea.hbm %s2277_s4, 2048 }
  0x4d   : > { %p1607_p11 = scmp.ne.s32.totalorder %s2277_s4, %s1606_s27  ;;  %p1613_p4 = scmp.lt.u32.totalorder %s1606_s27, %s2277_s4 }
  0x4f   : > { %p1609_p13 = pnand %p1607_p11, %p1904_p3 }
  0x51   : > { %p1610_p5 = pneg %p1609_p13 }
  0x53   : > { %p1615_p7 = pnand %p1613_p4, %p1610_p5 }
  0x55   : > { %1618 = shalt.err (!%p1615_p7)
}
  0x56   : > { %s1619_s20 = scalar_lea.vmem %s230_s25, 2048  ;;  %p1627_p6 = scmp.lt.s32.totalorder %s230_s25, %s230_s25 }
  0x57   : > { %p1620_p9 = scmp.ne.s32.totalorder %s230_s25, %s1619_s20  ;;  %p1628_p8 = scmp.lt.s32.totalorder %s1619_s20, %s1619_s20 }
  0x59   : > { %p1622_p12 = pnand %p1620_p9, %p1904_p3  ;;  %p1629_p10 = por %p1628_p8, %p1627_p6 }
  0x5b   : > { %p1623_p2 = pneg %p1622_p12 }
  0x5d   : > { %p1630_p0 = pnand %p1629_p10, %p1623_p2 }
  0x5f   : > { %1633 = shalt.err (!%p1630_p0)
}
  0x60   : > { %1469 = dma.hbm_to_vmem [thread:$0]  (!%p1888_p1), %s2277_s4, 2048, %s230_s25, [#allocation14], %s1776_s10, %s1776_s10, %s1777_s15  }
  0x61   : > { %s1969_s8 = sadd.s32 1, %s1770_s14   ;;  %s38_s21 = sadd.s32 1, %s1766_s13 }
  0x62   : > { %s35_s23 = ssub.s32 %s1770_s14, %s1969_s8  ;;  %p45_p11 = scmp.ne.s32.totalorder %s1766_s13, %s1762_s12 }
  0x63   : > { %p36_p3 = scmp.eq.s32.totalorder %s35_s23, 0  ;;  %p46_p13 = scmp.eq.s32.totalorder %s1770_s14, 0 }
  0x64   : > { %p1481_p5 = scmp.lt.s32.totalorder %s1770_s14, 2  ;;  %p2289_p7 = scmp.eq.s32.totalorder %s1859_s0, 1 }
  0x65   : > { %s1979_s24 = scalar_select %p36_p3, %s1766_s13, %s38_s21  }
  0x66   : > { %p47_p4 = por %p46_p13, %p45_p11  ;;  %p1983_p9 = por %p2289_p7, %p45_p11 }
  0x67   : > { %s246_s27 = sand.u32 1, %s1766_s13   ;;  %s1076_s28 = sshll.u32 %s1770_s14, 9 }
  0x68   : > { %s1029_s25 = sshll.u32 %s246_s27, 5  ;;  %s1992_s9 = scalar_lea.hbm %s2274_s1, %s1076_s28 }
  0x69   : > { %s250_s20 = scalar_lea.vmem [#allocation7], %s1029_s25  ;;  %p1994_p1 = pnand %p1481_p5, %p47_p4 }
  0x6a   : > { %s257_s22 = sshll.u32 %s250_s20, 4  ;;  %s2000_s23 = scalar_lea.sflag [#allocation8], %s246_s27  ;;  %s1998_s22 = int_to_ptr.vmem [resolvable:$true] %s257_s22 }
  0x6b   : > { %s1634_s21 = scalar_lea.hbm %s1992_s9, 512  ;;  %p1636_p2 = pneg %p1994_p1 }
  0x6c   : > { %p1635_p12 = scmp.ne.s32.totalorder %s1992_s9, %s1634_s21  ;;  %s1639_s29 = scalar_lea.hbm %s2274_s1, 1024 }
  0x6d   : > { %p1640_p10 = scmp.lt.u32.totalorder %s1992_s9, %s2274_s1  ;;  %p1641_p0 = scmp.lt.u32.totalorder %s1639_s29, %s1634_s21 }
  0x6e   : > { %p1637_p6 = pnand %p1636_p2, %p1635_p12  ;;  %p1643_p11 = scmp.lt.u32.totalorder %s1634_s21, %s1992_s9 }
  0x6f   : > { %p1642_p3 = por %p1641_p0, %p1640_p10 }
  0x70   : > { %p1638_p8 = pneg %p1637_p6 }
  0x71   : > { %p1644_p13 = por %p1643_p11, %p1642_p3 }
  0x73   : > { %p1645_p5 = pnand %p1644_p13, %p1638_p8 }
  0x75   : > { %1648 = shalt.err (!%p1645_p5)
}
  0x76   : > { %s1649_s27 = scalar_lea.vmem %s1998_s22, 512  ;;  %s1778_s28 = smov [#allocation7]  }
  0x77   : > { %p1650_p4 = scmp.ne.s32.totalorder %s1998_s22, %s1649_s27  ;;  %s1654_s25 = sshll.u32 %s1778_s28, 4  ;;  %s1655_s25 = int_to_ptr.vmem [resolvable:$false] %s1654_s25 }
  0x78   : > { %s1656_s30 = scalar_lea.vmem %s1655_s25, 1024  ;;  %p1657_p6 = scmp.lt.s32.totalorder %s1998_s22, %s1655_s25 }
  0x79   : > { %p1652_p7 = pnand %p1650_p4, %p1636_p2  ;;  %p1658_p10 = scmp.lt.s32.totalorder %s1656_s30, %s1649_s27 }
  0x7b   : > { %p1653_p12 = pneg %p1652_p7  ;;  %p1659_p0 = por %p1658_p10, %p1657_p6 }
  0x7d   : > { %p1660_p3 = pnand %p1659_p0, %p1653_p12 }
  0x7f   : > { %1663 = shalt.err (!%p1660_p3)
}
  0x80   : > { %1473 = dma.hbm_to_vmem [thread:$0]  (!%p1994_p1), %s1992_s9, 512, %s1998_s22, %s2000_s23, %s1776_s10, %s1776_s10, %s1777_s15  }
  0x81   : > { %p2292_p2 = scmp.ne.s32.totalorder %s2286_s18, 0 }
  0x82   : > { %s2034_s21 = sand.u32 (!%p2292_p2), 1, %s1762_s12   ;;  %p2293_p8 = scmp.ne.s32.totalorder (!%p2292_p2), %s2284_s16, 0 }
  0x83   : > { %269 = sbr.rel (%p2292_p2) target bundleno = 1158 (0x486), region = 40  ;;  %s1033_s29 = sshll.u32 (!%p2292_p2), %s2034_s21, 5 }
  0x84   : > { %s272_s20 = scalar_lea.sflag (!%p2292_p2), [#allocation8], %s2034_s21  ;;  %s2038_s27 = scalar_lea.vmem (!%p2292_p2), [#allocation7], %s1033_s29 }
  0x8a   : > { %1737 = dma.done.wait (%p2293_p8), %s272_s20, 512  }
  0x8b   : > { %1739 = vsyncadd (%p2293_p8), %s272_s20, 4294966784  ;;  %p2294_p1 = scmp.eq.s32.totalorder %s1859_s0, 0 }
  0x8d   : > { %1741 = dma.done.wait (%p2294_p1), [#allocation11], 1152   ;;  %p2295_p11 = pmov %p2294_p1 }
  0x8e   : > { %p2296_p13 = pmov %p2294_p1 }
  0x8f   : > { %1743 = vsyncadd (%p2295_p11), [#allocation11], 4294966144 }
  0x90   : > { %1745 = dma.done.wait (%p2296_p13), [#allocation14], 2048   ;;  %p2297_p5 = pmov %p2294_p1 }
  0x91   : > { %s2052_s18 = scalar_lea.vmem [#allocation15], %s1033_s29  ;;  %p2298_p4 = scmp.ne.s32.totalorder %s1859_s0, 0 }
  0x92   : > { %1747 = vsyncadd (%p2297_p5), [#allocation14], 4294965248  ;;  %v322_v0 = vld [vmem:[#allocation10] sm:$0xff] (!%p2298_p4) }
  0x93   : > { %321 = sbr.rel (%p2298_p4) target bundleno = 154 (0x9a), region = 60  ;;  %323 = vst [vmem:[#allocation2] sm:$0xff] (!%p2298_p4), %v322_v0  ;;  %324 = vst [vmem:[#allocation3] sm:$0xff] (!%p2298_p4), %v322_v0 }
  0x9a PF: > { %v462_v1 = vld [vmem:[#allocation13] sm:$0xff]  ;;  %v463_v2 = vld [vmem:[#allocation13 + $0x8] sm:$0xff]  ;;  %v464_v3 = vld [vmem:[#allocation13 + $0x10] sm:$0xff]  ;;  %v1779_v4 = vmov 0.0|0.0   ;;  %s2060_s16 = sshll.u32 %s1859_s0, 2  ;;  %vm1780_vm0 = vmmov 0   ;;  %v446_v37 = vlaneseq }
  0x9b   : > { %1344 = vmatprep.subr.bf16.mxu1 %v1779_v4  ;;  %v2057_v5 = vpack.c.bf16 %v463_v2, %v462_v1  ;;  %v465_v6 = vld [vmem:[#allocation13 + $0x18] sm:$0xff]  ;;  %v329_v7 = vld [vmem:[#allocation12] sm:$0xff]  ;;  %v330_v8 = vld [vmem:[#allocation12 + $0x8] sm:$0xff]  ;;  %v1781_v9 = vmov 0.0   ;;  %s2065_s10 = sadd.s32 4294967295, %s2060_s16  ;;  %vm344_vm1 = vcmask 523264  }
  0x9c   : > { %1220 = vmatprep.mubr.msk.f32.mxu1 %vm1780_vm0, %v1781_v9  ;;  %v2068_v10 = vpack.c.bf16 %v465_v6, %v464_v3  ;;  %v1328_v11 = vpack.c.bf16 %v330_v8, %v329_v7  ;;  %v331_v12 = vld [vmem:[#allocation12 + $0x10] sm:$0xff]  ;;  %v332_v13 = vld [vmem:[#allocation12 + $0x18] sm:$0xff]  ;;  %v466_v14 = vld [vmem:[#allocation13 + $0x20] sm:$0xff]  ;;  %p451_p7 = scmp.gt.s32.totalorder %s2065_s10, 0  ;;  %p1045_p12 = scmp.lt.s32.totalorder %s2065_s10, 7  ;;  %v2103_v41 = vshrl.u32 %v446_v37, 7 }
  0x9d   : > { %1346 = vmatpush3.bf16.msra.mxu1 %v2057_v5  ;;  %v467_v15 = vld [vmem:[#allocation13 + $0x28] sm:$0xff]  ;;  %v1332_v16 = vpack.c.bf16 %v332_v13, %v331_v12  ;;  %v333_v17 = vld [vmem:[#allocation12 + $0x20] sm:$0xff]  ;;  %v468_v20 = vld [vmem:[#allocation13 + $0x30] sm:$0xff]  ;;  %p557_p6 = scmp.gt.s32.totalorder %s2060_s16, 0  ;;  %p1050_p10 = scmp.lt.s32.totalorder %s2060_s16, 7 }
  0x9e   : > { %1347 = vmatprep.subr.bf16.mxu1 %v1779_v4  ;;  %1329 = vmatprep.subr.bf16.mxu0 %v1328_v11  ;;  %v334_v18 = vld [vmem:[#allocation12 + $0x28] sm:$0xff]  ;;  %v2073_v19 = vpack.c.bf16 %v467_v15, %v466_v14  ;;  %v325_v22 = vld [vmem:[%s2038_s27] sm:$0xff]  ;;  %v335_v24 = vld [vmem:[#allocation12 + $0x30] sm:$0xff]  ;;  %s2311_s10 = smov (!%p451_p7, %s2065_s10), 0  ;;  %s449_s23 = sld [smem:[#allocation6 + %s2060_s16]] }
  0x9f   : > { %1331 = vmatpush3.bf16.msra.mxu0 %v1328_v11  ;;  %v1336_v21 = vpack.c.bf16 %v334_v18, %v333_v17  ;;  %v469_v23 = vld [vmem:[#allocation13 + $0x38] sm:$0xff]  ;;  %1182 = vmatprep.mubr.msk.f32.mxu0 %vm344_vm1, %v325_v22  ;;  %v470_v28 = vld [vmem:[#allocation13 + $0x40] sm:$0xff]  ;;  %v471_v29 = vld [vmem:[#allocation13 + $0x48] sm:$0xff]  ;;  %s2313_s10 = smov (!%p1045_p12, %s2311_s10), 7  ;;  %s555_s25 = sadd.s32 1, %s2060_s16 }
  0xa0   : > { %1333 = vmatprep.subr.bf16.mxu0 %v1332_v16  ;;  %v336_v25 = vld [vmem:[#allocation12 + $0x38] sm:$0xff]  ;;  %v2083_v26 = vpack.c.bf16 %v469_v23, %v468_v20  ;;  %v2087_v30 = vpack.c.bf16 %v471_v29, %v470_v28  ;;  %v472_v31 = vld [vmem:[#allocation13 + $0x50] sm:$0xff]  ;;  %s455_s15 = sld [smem:[#allocation6 + %s2313_s10]]  ;;  %v326_v33 = vld [vmem:[%s2038_s27 + $0x8] sm:$0xff]  ;;  %p665_p0 = scmp.gt.s32.totalorder %s555_s25, 0 }
  0xa1   : > { %1349 = vmatpush3.bf16.msra.mxu1 %v2068_v10  ;;  %v1340_v27 = vpack.c.bf16 %v336_v25, %v335_v24  ;;  %v473_v32 = vld [vmem:[#allocation13 + $0x58] sm:$0xff]  ;;  %v474_v35 = vld [vmem:[#allocation13 + $0x60] sm:$0xff]  ;;  %v475_v36 = vld [vmem:[#allocation13 + $0x68] sm:$0xff]  ;;  %s558_s9 = scalar_select %p557_p6, %s2060_s16, 0 }
  0xa2   : > { %1350 = vmatprep.subr.bf16.mxu1 %v1779_v4  ;;  %v2092_v34 = vpack.c.bf16 %v473_v32, %v472_v31  ;;  %v2099_v38 = vpack.c.bf16 %v475_v36, %v474_v35  ;;  %v476_v39 = vld [vmem:[#allocation13 + $0x70] sm:$0xff]  ;;  %v477_v40 = vld [vmem:[#allocation13 + $0x78] sm:$0xff]  ;;  %v458_v44 = vld [vmem:[#allocation2] sm:$0xff]  ;;  %s666_s30 = scalar_select %p665_p0, %s555_s25, 0 }
  0xa3   : > { %1335 = vmatpush3.bf16.msra.mxu0 %v1332_v16  ;;  %v2107_v43 = vpack.c.bf16 %v477_v40, %v476_v39  ;;  %v2112_v45 = vld [vmem:[#allocation3] sm:$0xff]  ;;  %v327_v47 = vld [vmem:[%s2038_s27 + $0x10] sm:$0xff]  ;;  %s2315_s9 = smov (!%p1050_p10, %s558_s9), 7  ;;  %p1056_p3 = scmp.lt.s32.totalorder %s555_s25, 7 }
  0xa4   : > { %1337 = vmatprep.subr.bf16.mxu0 %v1336_v21  ;;  %v328_v48 = vld [vmem:[%s2038_s27 + $0x18] sm:$0xff]  ;;  %v2158_v51 = vld [vmem:[%s2278_s5] ss:$0 sm:$0xff]  ;;  %s561_s28 = sld [smem:[#allocation6 + %s2315_s9]]  ;;  %v550_v56 = vstv %s449_s23  ;;  %s663_s27 = sadd.s32 2, %s2060_s16 }
  0xa5   : > { %1352 = vmatpush3.bf16.msra.mxu1 %v2073_v19  ;;  %vm551_vm3 = vcmp.lt.s32.totalorder %v2103_v41, %v550_v56  ;;  %s2317_s30 = smov (!%p1056_p3, %s666_s30), 7  ;;  %s556_s29 = sld [smem:[#allocation6 + %s555_s25]] }
  0xa6   : > { %1353 = vmatprep.subr.bf16.mxu1 %v1779_v4  ;;  %v456_v42 = vstv %s455_s15  ;;  %s669_s20 = sld [smem:[#allocation6 + %s2317_s30]]  ;;  %p773_p2 = scmp.gt.s32.totalorder %s663_s27, 0 }
  0xa7   : > { %1339 = vmatpush3.bf16.msra.mxu0 %v1336_v21  ;;  %vm457_vm2 = vcmp.lt.s32.totalorder %v2103_v41, %v456_v42  ;;  %p1062_p8 = scmp.lt.s32.totalorder %s663_s27, 7  ;;  %s664_s15 = sld [smem:[#allocation6 + %s663_s27]] }
  0xa8   : > { %1341 = vmatprep.subr.bf16.mxu0 %v1340_v27  ;;  %v460_v46 = vsel %vm457_vm2, %v458_v44, %v2112_v45  ;;  %s774_s10 = scalar_select %p773_p2, %s663_s27, 0 }
  0xa9   : > { %1355 = vmatpush3.bf16.msra.mxu1 %v2083_v26  ;;  %s771_s22 = sadd.s32 3, %s2060_s16  ;;  %p1068_p1 = scmp.ne.s32.totalorder %s1859_s0, 1 }
  0xaa   : > { %1356 = vmatprep.subr.bf16.mxu1 %v1779_v4  ;;  %v562_v57 = vstv %s561_s28  ;;  %s2319_s10 = smov (!%p1062_p8, %s774_s10), 7  ;;  %s772_s19 = sld [smem:[#allocation6 + %s771_s22]] }
  0xab   : > { %1343 = vmatpush3.bf16.msra.mxu0 %v1340_v27  ;;  %vm563_vm4 = vcmp.lt.s32.totalorder %v2103_v41, %v562_v57  ;;  %v657_v3 = vstv %s556_s29  ;;  %s777_s9 = sld [smem:[#allocation6 + %s2319_s10]] }
  0xac   : > { %1368 = vmatprep.subr.bf16.mxu0 %v1779_v4  ;;  %vm658_vm5 = vcmp.lt.s32.totalorder %v2103_v41, %v657_v3 }
  0xad   : > { %1358 = vmatpush3.bf16.msra.mxu1 %v2087_v30  ;;  %v765_v12 = vstv %s664_s15 }
  0xae   : > { %1359 = vmatprep.subr.bf16.mxu1 %v1779_v4  ;;  %1183 = vmatmul.mubr.msk.f32.vlgmr.msra.gmra.mrb[0].mxu0 %vm344_vm1, %v326_v33  ;;  %vm766_vm7 = vcmp.lt.s32.totalorder %v2103_v41, %v765_v12 }
  0xaf   : > { %1370 = vmatpush3.bf16.msra.mxu0 %v2057_v5  ;;  %1185 = vmatprep.mubr.msk.f32.mxu0 %vm344_vm1, %v327_v47 }
  0xb0   : > { %1371 = vmatprep.subr.bf16.mxu0 %v1779_v4  ;;  %v873_v21 = vstv %s772_s19 }
  0xb1   : > { %1361 = vmatpush3.bf16.msra.mxu1 %v2092_v34  ;;  %v778_v13 = vstv %s777_s9  ;;  %vm874_vm9 = vcmp.lt.s32.totalorder %v2103_v41, %v873_v21 }
  0xb2   : > { %1362 = vmatprep.subr.bf16.mxu1 %v1779_v4  ;;  %1186 = vmatmul.mubr.msk.f32.gmra.mrb[2].mxu0 %vm344_vm1, %v328_v48  ;;  %vm779_vm8 = vcmp.lt.s32.totalorder %v2103_v41, %v778_v13 }
  0xb3   : > { %1373 = vmatpush3.bf16.msra.mxu0 %v2068_v10  ;;  %1255 = vmatprep.mubr.msk.f32.mxu0 %vm1780_vm0, %v1781_v9 }
  0xb4   : > { %1374 = vmatprep.subr.bf16.mxu0 %v1779_v4 }
  0xb5   : > { %1364 = vmatpush3.bf16.msra.mxu1 %v2099_v38 }
  0xb6   : > { %1365 = vmatprep.subr.bf16.mxu1 %v1779_v4 }
  0xb7   : > { %1376 = vmatpush3.bf16.msra.mxu0 %v2073_v19 }
  0xb8   : > { %1377 = vmatprep.subr.bf16.mxu0 %v1779_v4 }
  0xb9   : > { %1367 = vmatpush3.bf16.msra.mxu1 %v2107_v43 }
  0xba   : > { %1392 = vmatprep.subr.bf16.mxu1 %v1779_v4 }
  0xbb   : > { %1379 = vmatpush3.bf16.msra.mxu0 %v2083_v26 }
  0xbc   : > { %1221 = vmatmul.mubr.f32.vlgmr.msra.gmra.mrb[0].mxu1 %v460_v46  ;;  %1380 = vmatprep.subr.bf16.mxu0 %v1779_v4 }
  0xbd   : > { %1394 = vmatpush3.bf16.msra.mxu1 %v2057_v5  ;;  %1290 = vmatprep.mubr.msk.f32.mxu1 %vm1780_vm0, %v1781_v9 }
  0xbe   : > { %1395 = vmatprep.subr.bf16.mxu1 %v1779_v4 }
  0xbf   : > { %1382 = vmatpush3.bf16.msra.mxu0 %v2087_v30 }
  0xc0   : > { %1383 = vmatprep.subr.bf16.mxu0 %v1779_v4 }
  0xc1   : > { %1397 = vmatpush3.bf16.msra.mxu1 %v2068_v10 }
  0xc2   : > { %1398 = vmatprep.subr.bf16.mxu1 %v1779_v4 }
  0xc3   : > { %1385 = vmatpush3.bf16.msra.mxu0 %v2092_v34 }
  0xc4   : > { %1386 = vmatprep.subr.bf16.mxu0 %v1779_v4 }
  0xc5   : > { %1400 = vmatpush3.bf16.msra.mxu1 %v2073_v19 }
  0xc6   : > { %1401 = vmatprep.subr.bf16.mxu1 %v1779_v4 }
  0xc7   : > { %1388 = vmatpush3.bf16.msra.mxu0 %v2099_v38 }
  0xc8   : > { %1389 = vmatprep.subr.bf16.mxu0 %v1779_v4 }
  0xc9   : > { %1403 = vmatpush3.bf16.msra.mxu1 %v2083_v26 }
  0xca   : > { %1404 = vmatprep.subr.bf16.mxu1 %v1779_v4 }
  0xcb   : > { %1391 = vmatpush3.bf16.msra.mxu0 %v2107_v43 }
  0xcc   : > { %1416 = vmatprep.subr.bf16.mxu0 %v1779_v4 }
  0xcd   : > { %1406 = vmatpush3.bf16.msra.mxu1 %v2087_v30 }
  0xce   : > { %1407 = vmatprep.subr.bf16.mxu1 %v1779_v4 }
  0xd1   : > { %1409 = vmatpush3.bf16.msra.mxu1 %v2092_v34 }
  0xd2   : > { %1410 = vmatprep.subr.bf16.mxu1 %v1779_v4 }
  0xd5   : > { %1412 = vmatpush3.bf16.msra.mxu1 %v2099_v38 }
  0xd6   : > { %1413 = vmatprep.subr.bf16.mxu1 %v1779_v4 }
  0xd9   : > { %1415 = vmatpush3.bf16.msra.mxu1 %v2107_v43 }
 0x181   : > { %v1184_v49 = vpop.f32.mrb[0].mxu0 }
 0x182   : > { %v423_v50 = vpop.f32.mrb[1].mxu0  ;;  %v429_v63 = vadd.f32 %v1184_v49, %v2158_v51 }
 0x183   : > { %v424_v52 = vadd.f32 %v2158_v51, %v423_v50 }
 0x185   : > { %v1187_v61 = vpop.f32.mrb[2].mxu0 }
 0x186   : > { %v433_v62 = vpop.f32.mrb[3].mxu0  ;;  %v439_v17 = vadd.f32 %v1187_v61, %v2158_v51 }
 0x187   : > { %v434_v8 = vadd.f32 %v2158_v51, %v433_v62 }
 0x18f   : > { %v544_v53 = vpop.f32.mrb[0].mxu1 }
 0x190   : > { %v548_v54 = vadd.f32 %v544_v53, %v424_v52  ;;  %v1222_v55 = vpop.f32.mrb[1].mxu1 }
 0x192   : > { %1532 = vtanh.f32 %v548_v54 }
 0x19c   : > { %v1533_v58 = vpop.eup %1532 }
 0x19d   : > { %v552_v59 = vsel %vm551_vm3, %v1533_v58, %v458_v44  ;;  %554 = vst [vmem:[%s2052_s18] sm:$0xff] %v1533_v58 }
 0x19e   : > { %v566_v60 = vsel %vm563_vm4, %v552_v59, %v2112_v45 }
 0x19f   : > { %1256 = vmatmul.mubr.f32.vlgmr.msra.gmra.mrb[4].mxu0 %v566_v60 }
 0x1a0   : > { %1418 = vmatpush3.bf16.msra.mxu0 %v2057_v5  ;;  %1325 = vmatprep.mubr.msk.f32.mxu0 %vm1780_vm0, %v1781_v9 }
 0x1a1   : > { %1419 = vmatprep.subr.bf16.mxu0 %v1779_v4 }
 0x1a4   : > { %1421 = vmatpush3.bf16.msra.mxu0 %v2068_v10 }
 0x1a5   : > { %1422 = vmatprep.subr.bf16.mxu0 %v1779_v4 }
 0x1a8   : > { %1424 = vmatpush3.bf16.msra.mxu0 %v2073_v19 }
 0x1a9   : > { %1425 = vmatprep.subr.bf16.mxu0 %v1779_v4 }
 0x1ac   : > { %1427 = vmatpush3.bf16.msra.mxu0 %v2083_v26 }
 0x1ad   : > { %1428 = vmatprep.subr.bf16.mxu0 %v1779_v4 }
 0x1b0   : > { %1430 = vmatpush3.bf16.msra.mxu0 %v2087_v30 }
 0x1b1   : > { %1431 = vmatprep.subr.bf16.mxu0 %v1779_v4 }
 0x1b4   : > { %1433 = vmatpush3.bf16.msra.mxu0 %v2092_v34 }
 0x1b5   : > { %1434 = vmatprep.subr.bf16.mxu0 %v1779_v4 }
 0x1b8   : > { %1436 = vmatpush3.bf16.msra.mxu0 %v2099_v38 }
 0x1b9   : > { %1437 = vmatprep.subr.bf16.mxu0 %v1779_v4  ;;  %v670_v4 = vstv %s669_s20 }
 0x1ba   : > { %vm671_vm6 = vcmp.lt.s32.totalorder %v2103_v41, %v670_v4 }
 0x1bc   : > { %1439 = vmatpush3.bf16.msra.mxu0 %v2107_v43 }
 0x272   : > { %v651_v0 = vpop.f32.mrb[4].mxu0 }
 0x273   : > { %v655_v1 = vadd.f32 %v651_v0, %v429_v63  ;;  %v1257_v2 = vpop.f32.mrb[5].mxu0 }
 0x275   : > { %1534 = vtanh.f32 %v655_v1 }
 0x27f   : > { %v1535_v5 = vpop.eup %1534 }
 0x280   : > { %1055 = vst [vmem:[%s2052_s18 + $0x8] sm:$0xff] %v1535_v5  ;;  %v659_v6 = vsel %vm658_vm5, %v1535_v5, %v552_v59 }
 0x281   : > { %v674_v7 = vsel %vm671_vm6, %v659_v6, %v2112_v45 }
 0x282   : > { %1291 = vmatmul.mubr.f32.vlgmr.msra.gmra.mrb[2].mxu1 %v674_v7 }
 0x355   : > { %v759_v9 = vpop.f32.mrb[2].mxu1 }
 0x356   : > { %v763_v10 = vadd.f32 %v759_v9, %v434_v8  ;;  %v1292_v11 = vpop.f32.mrb[3].mxu1 }
 0x358   : > { %1536 = vtanh.f32 %v763_v10 }
 0x362   : > { %v1537_v14 = vpop.eup %1536 }
 0x363   : > { %1061 = vst [vmem:[%s2052_s18 + $0x10] sm:$0xff] %v1537_v14  ;;  %v767_v15 = vsel %vm766_vm7, %v1537_v14, %v659_v6 }
 0x364   : > { %v782_v16 = vsel %vm779_vm8, %v767_v15, %v2112_v45 }
 0x365   : > { %1326 = vmatmul.mubr.f32.vlgmr.msra.gmra.mrb[6].mxu0 %v782_v16 }
 0x438   : > { %v867_v18 = vpop.f32.mrb[6].mxu0 }
 0x439   : > { %v871_v19 = vadd.f32 %v867_v18, %v439_v17  ;;  %v1327_v20 = vpop.f32.mrb[7].mxu0 }
 0x43b   : > { %1538 = vtanh.f32 %v871_v19 }
 0x441   : > { %882 = sbr.rel (%p1068_p1) target bundleno = 1104 (0x450), region = 64 }
 0x445   : > { %v1539_v22 = vpop.eup %1538 }
 0x446   : > { %v875_v23 = vsel %vm874_vm9, %v1539_v22, %v767_v15  ;;  %1067 = vst [vmem:[%s2052_s18 + $0x18] sm:$0xff] %v1539_v22 }
 0x447   : > { %876 = vst [vmem:[#allocation2] sm:$0xff] %v875_v23 }
 0x44e   : > { %v883_v24 = vld [vmem:[#allocation2] sm:$0xff] }
 0x44f   : > { %884 = vst [vmem:[#allocation16] sm:$0xff] %v883_v24 }
 0x450 PF: > { %s1085_s16 = sshll.u32 %s1859_s0, 9  ;;  %s899_s30 = sshll.u32 %s2052_s18, 4  ;;  %s2207_s30 = int_to_ptr.vmem [resolvable:$true] %s899_s30 }
 0x451   : > { %s2204_s25 = scalar_lea.hbm %s2279_s6, %s1085_s16  ;;  %s886_s29 = scalar_lea.sflag [#allocation9], %s2034_s21 }
 0x452   : > { %s1664_s20 = scalar_lea.vmem %s2207_s30, 512  ;;  %s1782_s27 = smov [#allocation15]  }
 0x453   : > { %p1665_p11 = scmp.ne.s32.totalorder %s2207_s30, %s1664_s20  ;;  %s1668_s10 = sshll.u32 %s1782_s27, 4  ;;  %s1669_s10 = int_to_ptr.vmem [resolvable:$false] %s1668_s10 }
 0x454   : > { %s1670_s15 = scalar_lea.vmem %s1669_s10, 1024  ;;  %p1671_p4 = scmp.lt.s32.totalorder %s2207_s30, %s1669_s10 }
 0x455   : > { %p1666_p13 = pnand %p1665_p11, %p1983_p9  ;;  %p1672_p7 = scmp.lt.s32.totalorder %s1670_s15, %s1664_s20 }
 0x457   : > { %p1667_p5 = pneg %p1666_p13  ;;  %p1673_p12 = por %p1672_p7, %p1671_p4 }
 0x459   : > { %p1674_p6 = pnand %p1673_p12, %p1667_p5 }
 0x45b   : > { %1677 = shalt.err (!%p1674_p6)
}
 0x45c   : > { %s1678_s18 = scalar_lea.hbm %s2204_s25, 512  ;;  %s1682_s19 = scalar_lea.hbm %s2279_s6, 1024 }
 0x45d   : > { %p1679_p10 = scmp.ne.s32.totalorder %s2204_s25, %s1678_s18  ;;  %p1683_p2 = scmp.lt.u32.totalorder %s2204_s25, %s2279_s6 }
 0x45e   : > { %p1684_p8 = scmp.lt.u32.totalorder %s1682_s19, %s1678_s18  ;;  %p1686_p11 = scmp.lt.u32.totalorder %s1678_s18, %s2204_s25 }
 0x45f   : > { %p1680_p0 = pnand %p1679_p10, %p1983_p9 }
 0x460   : > { %p1685_p1 = por %p1684_p8, %p1683_p2 }
 0x461   : > { %p1681_p3 = pneg %p1680_p0 }
 0x462   : > { %p1687_p13 = por %p1686_p11, %p1685_p1 }
 0x464   : > { %p1688_p5 = pnand %p1687_p13, %p1681_p3 }
 0x466   : > { %1691 = shalt.err (!%p1688_p5)
}
 0x467   : > { %s1783_s28 = smov 128   ;;  %s1784_s20 = smov 8  }
 0x468   : > { %1454 = dma.vmem_to_hbm [thread:$0]  (%p1983_p9), %s2207_s30, 512, %s2204_s25, %s886_s29, %s1783_s28, %s1783_s28, %s1784_s20  }
 0x469   : > { %s1785_s27 = smov [#allocation16]   ;;  %p2299_p7 = scmp.eq.s32.totalorder %s1859_s0, 1 }
 0x46a   : > { %s913_s10 = sshll.u32 %s1785_s27, 4  ;;  %s914_s10 = int_to_ptr.vmem [resolvable:$true] %s913_s10 }
 0x46b   : > { %s1692_s15 = scalar_lea.vmem %s914_s10, 128  ;;  %p1699_p10 = scmp.lt.s32.totalorder %s914_s10, %s914_s10 }
 0x46c   : > { %p1693_p4 = scmp.ne.s32.totalorder %s914_s10, %s1692_s15  ;;  %p1700_p0 = scmp.lt.s32.totalorder %s1692_s15, %s1692_s15 }
 0x46e   : > { %p1694_p12 = pnand %p1693_p4, %p2299_p7  ;;  %p1701_p3 = por %p1700_p0, %p1699_p10 }
 0x470   : > { %p1695_p6 = pneg %p1694_p12 }
 0x472   : > { %p1702_p2 = pnand %p1701_p3, %p1695_p6 }
 0x474   : > { %1705 = shalt.err (!%p1702_p2)
}
 0x475   : > { %s1706_s26 = scalar_lea.hbm %s2280_s7, 128  ;;  %p2300_p8 = pmov %p2299_p7 }
 0x476   : > { %p1707_p9 = scmp.ne.s32.totalorder %s2280_s7, %s1706_s26  ;;  %p1712_p13 = scmp.lt.u32.totalorder %s1706_s26, %s2280_s7 }
 0x478   : > { %p1708_p1 = pnand %p1707_p9, %p2300_p8 }
 0x47a   : > { %p1709_p11 = pneg %p1708_p1 }
 0x47c   : > { %p1714_p5 = pnand %p1712_p13, %p1709_p11 }
 0x47e   : > { %1717 = shalt.err (!%p1714_p5)
}
 0x47f   : > { %p2301_p4 = pmov %p2299_p7 }
 0x481   : > { %1456 = dma.vmem_to_hbm [thread:$0]  (%p2301_p4), %s914_s10, 128, %s2280_s7, [#allocation17]  }
 0x482   : > { %p2302_p7 = pmov %p2301_p4 }
 0x483   : > { %p2303_p12 = pmov %p2301_p4 }
 0x484   : > { %1749 = dma.done.wait (%p2302_p7), [#allocation17], 128  }
 0x485   : > { %1751 = vsyncadd (%p2303_p12), [#allocation17], 4294967168 }
 0x486 PF: > { %s929_s16 = sand.u32 1, %s1758_s11   ;;  %p2304_p6 = scmp.ne.s32.totalorder %s2285_s17, 0 }
 0x487   : > { %p2305_p10 = scmp.ge.s32.totalorder %s1770_s14, 2  ;;  %s930_s23 = scalar_lea.sflag [#allocation9], %s929_s16 }
 0x489   : > { %p1475_p0 = pnand %p2305_p10, %p2304_p6 }
 0x48b   : > { %1753 = dma.done.wait (!%p1475_p0), %s930_s23, 512  }
 0x48c   : > { %1755 = vsyncadd (!%p1475_p0), %s930_s23, 4294966784  ;;  %p28_p3 = scmp.ge.s32.totalorder %s1969_s8, 4   ;;  %s2306_s11 = smov %s1762_s12 }
 0x48d   : > { %s2307_s12 = smov %s1766_s13  ;;  %s2308_s13 = smov %s1979_s24 }
 0x48e   : > { %s2309_s14 = smov %s1969_s8  ;;  %30 = sbr.rel (!%p28_p3) target bundleno = 20 (0x14), region = 119 }
 0x495   :  { %935 = vsyncpa [#allocation8], 1 }
 0x496   :  { %937 = vsyncpa [#allocation8 + $0x1], 1 }
 0x497   :  { %938 = vsyncpa [#allocation11], 1 }
 0x498   :  { %939 = vsyncpa [#allocation14], 1 }
 0x499   :  { %940 = vsyncpa [#allocation9], 1 }
 0x49a   :  { %942 = vsyncpa [#allocation9 + $0x1], 1 }
 0x49b   :  { %943 = vsyncpa [#allocation17], 1 }

// kernel: tpu_custom_call.1
= control target key start
LH: loop header
LB: loop body
LE: loop exit
PB: predicated region body
PF: predicated region fallthrough
CT: control target
= control target key end

     0   :  { %s2273_s0 = inlined_call_operand.hbm [shape: s32[8], index: 0, kind: input, shape index: {}]   ;;  %s2274_s1 = inlined_call_operand.hbm [shape: f32[64,64], index: 1, kind: input, shape index: {}]   ;;  %s2275_s2 = inlined_call_operand.hbm [shape: f32[8,128], index: 2, kind: input, shape index: {}]   ;;  %s2276_s3 = inlined_call_operand.hbm [shape: f32[64,128], index: 3, kind: input, shape index: {}]   ;;  %s2277_s4 = inlined_call_operand.hbm [shape: f32[128,128], index: 4, kind: input, shape index: {}]   ;;  %s2278_s5 = inlined_call_operand.vmem [shape: f32[1,128], index: 5, kind: input, shape index: {}]   ;;  %s2279_s6 = inlined_call_operand.hbm [shape: f32[64,128], index: 6, kind: output, shape index: {0}]   ;;  %s2280_s7 = inlined_call_operand.hbm [shape: f32[8,128], index: 7, kind: output, shape index: {1}]  }
   0x1   :  { %s1540_s26 = scalar_lea.hbm %s2273_s0, 16 }
   0x2   :  { %p1541_p0 = scmp.ne.s32.totalorder %s2273_s0, %s1540_s26  ;;  %p1544_p1 = scmp.lt.u32.totalorder %s1540_s26, %s2273_s0 }
   0x4   :  { %p1546_p2 = pnand %p1544_p1, %p1541_p0 }
   0x6   :  { %1549 = shalt.err (!%p1546_p2)  }
   0x7   :  { %s1772_s8 = smov [#allocation6]  }
   0x8   :  { %14 = dma.hbm_to_smem %s2273_s0, 16, %s1772_s8, [#allocation5] }
   0x9   :  { %1734 = dma.done.wait [#allocation5], 16 }
   0xa   :  { %1735 = vsyncadd [#allocation5], 4294967280 }
   0xb   :  { %16 = sfence }
   0xc   :  { %17 = vsyncpa [#allocation8], 0 }
   0xd   :  { %19 = vsyncpa [#allocation8 + $0x1], 0 }
   0xe   :  { %20 = vsyncpa [#allocation11], 0 }
   0xf   :  { %21 = vsyncpa [#allocation14], 0 }
  0x10   :  { %22 = vsyncpa [#allocation9], 0 }
  0x11   :  { %24 = vsyncpa [#allocation9 + $0x1], 0 }
  0x12   :  { %25 = vsyncpa [#allocation17], 0  ;;  %s1838_s11 = smov 0   ;;  %s1840_s12 = smov 0  }
  0x13   :  { %s1842_s13 = smov 0   ;;  %s1844_s14 = smov 0  }
  0x14 LB: > { %s1859_s0 = sadd.s32 4294967295, %s1770_s14   ;;  %s1023_s15 = sadd.s32 4294967294, %s1770_s14   ;;  %s1770_s14 = sphi %s1844_s14, %s2309_s14   ;;  %s1766_s13 = sphi %s1842_s13, %s2308_s13   ;;  %s1762_s12 = sphi %s1840_s12, %s2307_s12   ;;  %s1758_s11 = sphi %s1838_s11, %s2306_s11  }
  0x15   : > { %p51_p3 = scmp.ne.s32.totalorder %s1762_s12, %s1758_s11  ;;  %p2281_p4 = scmp.eq.s32.totalorder %s1859_s0, 0 }
  0x16   : > { %p165_p6 = scmp.eq.s32.totalorder %s1023_s15, 1  ;;  %p1024_p8 = scmp.ge.s32.totalorder %s1770_s14, 1 }
  0x17   : > { %p1868_p7 = por %p2281_p4, %p51_p3  ;;  %p193_p10 = scmp.lt.s32.totalorder %s1770_s14, 3 }
  0x18   : > { %p1873_p9 = por %p165_p6, %p51_p3  ;;  %s1773_s19 = smov [#allocation10]  }
  0x19   : > { %s2284_s16 = scalar_select %p1868_p7, 1, 0 }
  0x1a   : > { %s2285_s17 = scalar_select %p1873_p9, 1, 0 }
  0x1b   : > { %p1879_p12 = pnand %p1024_p8, %p193_p10  ;;  %s206_s20 = sshll.u32 %s1773_s19, 4  ;;  %s207_s20 = int_to_ptr.vmem [resolvable:$true] %s206_s20 }
  0x1c   : > { %s1774_s21 = smov [#allocation12]   ;;  %s1775_s24 = smov [#allocation13]  }
  0x1d   : > { %s2286_s18 = scalar_select %p1879_p12, 1, 0 }
  0x1e   : > { %p1460_p0 = pneg %p1879_p12  ;;  %s216_s22 = sshll.u32 %s1774_s21, 4  ;;  %s1892_s22 = int_to_ptr.vmem [resolvable:$true] %s216_s22 }
  0x1f   : > { %s1894_s25 = sshll.u32 %s1775_s24, 4  ;;  %s1550_s28 = scalar_lea.hbm %s2275_s2, 128  ;;  %s230_s25 = int_to_ptr.vmem [resolvable:$true] %s1894_s25 }
  0x20   : > { %p1888_p1 = pnand %p1460_p0, %p2281_p4  ;;  %p1551_p2 = scmp.ne.s32.totalorder %s2275_s2, %s1550_s28 }
  0x21   : > { %p1557_p10 = scmp.lt.u32.totalorder %s1550_s28, %s2275_s2 }
  0x22   : > { %p1904_p3 = pneg %p1888_p1 }
  0x24   : > { %p1553_p6 = pnand %p1904_p3, %p1551_p2 }
  0x26   : > { %p1554_p8 = pneg %p1553_p6 }
  0x28   : > { %p1559_p0 = pnand %p1557_p10, %p1554_p8 }
  0x2a   : > { %1562 = shalt.err (!%p1559_p0)
}
  0x2b   : > { %s1563_s15 = scalar_lea.vmem %s207_s20, 128  ;;  %p1571_p5 = scmp.lt.s32.totalorder %s207_s20, %s207_s20 }
  0x2c   : > { %p1564_p13 = scmp.ne.s32.totalorder %s207_s20, %s1563_s15  ;;  %p1572_p9 = scmp.lt.s32.totalorder %s1563_s15, %s1563_s15 }
  0x2e   : > { %p1566_p11 = pnand %p1564_p13, %p1904_p3  ;;  %p1573_p7 = por %p1572_p9, %p1571_p5 }
  0x30   : > { %p1567_p4 = pneg %p1566_p11 }
  0x32   : > { %p1574_p12 = pnand %p1573_p7, %p1567_p4 }
  0x34   : > { %1577 = shalt.err (!%p1574_p12)
}
  0x35   : > { %1463 = dma.hbm_to_vmem [thread:$0]  (!%p1888_p1), %s2275_s2, 128, %s207_s20, [#allocation11]  }
  0x36   : > { %s1578_s27 = scalar_lea.hbm %s2276_s3, 1024 }
  0x37   : > { %p1579_p11 = scmp.ne.s32.totalorder %s2276_s3, %s1578_s27  ;;  %p1585_p4 = scmp.lt.u32.totalorder %s1578_s27, %s2276_s3 }
  0x39   : > { %p1581_p13 = pnand %p1579_p11, %p1904_p3 }
  0x3b   : > { %p1582_p5 = pneg %p1581_p13 }
  0x3d   : > { %p1587_p7 = pnand %p1585_p4, %p1582_p5 }
  0x3f   : > { %1590 = shalt.err (!%p1587_p7)
}
  0x40   : > { %s1591_s20 = scalar_lea.vmem %s1892_s22, 1024  ;;  %p1599_p6 = scmp.lt.s32.totalorder %s1892_s22, %s1892_s22 }
  0x41   : > { %p1592_p9 = scmp.ne.s32.totalorder %s1892_s22, %s1591_s20  ;;  %p1600_p8 = scmp.lt.s32.totalorder %s1591_s20, %s1591_s20 }
  0x43   : > { %p1594_p12 = pnand %p1592_p9, %p1904_p3  ;;  %p1601_p10 = por %p1600_p8, %p1599_p6 }
  0x45   : > { %p1595_p2 = pneg %p1594_p12 }
  0x47   : > { %p1602_p0 = pnand %p1601_p10, %p1595_p2 }
  0x49   : > { %1605 = shalt.err (!%p1602_p0)
}
  0x4a   : > { %s1776_s10 = smov 128   ;;  %s1777_s15 = smov 8  }
  0x4b   : > { %1466 = dma.hbm_to_vmem [thread:$0]  (!%p1888_p1), %s2276_s3, 1024, %s1892_s22, [#allocation11], %s1776_s10, %s1776_s10, %s1777_s15  }
  0x4c   : > { %s1606_s27 = scalar_lea.hbm %s2277_s4, 2048 }
  0x4d   : > { %p1607_p11 = scmp.ne.s32.totalorder %s2277_s4, %s1606_s27  ;;  %p1613_p4 = scmp.lt.u32.totalorder %s1606_s27, %s2277_s4 }
  0x4f   : > { %p1609_p13 = pnand %p1607_p11, %p1904_p3 }
  0x51   : > { %p1610_p5 = pneg %p1609_p13 }
  0x53   : > { %p1615_p7 = pnand %p1613_p4, %p1610_p5 }
  0x55   : > { %1618 = shalt.err (!%p1615_p7)
}
  0x56   : > { %s1619_s20 = scalar_lea.vmem %s230_s25, 2048  ;;  %p1627_p6 = scmp.lt.s32.totalorder %s230_s25, %s230_s25 }
  0x57   : > { %p1620_p9 = scmp.ne.s32.totalorder %s230_s25, %s1619_s20  ;;  %p1628_p8 = scmp.lt.s32.totalorder %s1619_s20, %s1619_s20 }
  0x59   : > { %p1622_p12 = pnand %p1620_p9, %p1904_p3  ;;  %p1629_p10 = por %p1628_p8, %p1627_p6 }
  0x5b   : > { %p1623_p2 = pneg %p1622_p12 }
  0x5d   : > { %p1630_p0 = pnand %p1629_p10, %p1623_p2 }
  0x5f   : > { %1633 = shalt.err (!%p1630_p0)
}
  0x60   : > { %1469 = dma.hbm_to_vmem [thread:$0]  (!%p1888_p1), %s2277_s4, 2048, %s230_s25, [#allocation14], %s1776_s10, %s1776_s10, %s1777_s15  }
  0x61   : > { %s1969_s8 = sadd.s32 1, %s1770_s14   ;;  %s38_s21 = sadd.s32 1, %s1766_s13 }
  0x62   : > { %s35_s23 = ssub.s32 %s1770_s14, %s1969_s8  ;;  %p45_p11 = scmp.ne.s32.totalorder %s1766_s13, %s1762_s12 }
  0x63   : > { %p36_p3 = scmp.eq.s32.totalorder %s35_s23, 0  ;;  %p46_p13 = scmp.eq.s32.totalorder %s1770_s14, 0 }
  0x64   : > { %p1481_p5 = scmp.lt.s32.totalorder %s1770_s14, 2  ;;  %p2289_p7 = scmp.eq.s32.totalorder %s1859_s0, 1 }
  0x65   : > { %s1979_s24 = scalar_select %p36_p3, %s1766_s13, %s38_s21  }
  0x66   : > { %p47_p4 = por %p46_p13, %p45_p11  ;;  %p1983_p9 = por %p2289_p7, %p45_p11 }
  0x67   : > { %s246_s27 = sand.u32 1, %s1766_s13   ;;  %s1076_s28 = sshll.u32 %s1770_s14, 9 }
  0x68   : > { %s1029_s25 = sshll.u32 %s246_s27, 5  ;;  %s1992_s9 = scalar_lea.hbm %s2274_s1, %s1076_s28 }
  0x69   : > { %s250_s20 = scalar_lea.vmem [#allocation7], %s1029_s25  ;;  %p1994_p1 = pnand %p1481_p5, %p47_p4 }
  0x6a   : > { %s257_s22 = sshll.u32 %s250_s20, 4  ;;  %s2000_s23 = scalar_lea.sflag [#allocation8], %s246_s27  ;;  %s1998_s22 = int_to_ptr.vmem [resolvable:$true] %s257_s22 }
  0x6b   : > { %s1634_s21 = scalar_lea.hbm %s1992_s9, 512  ;;  %p1636_p2 = pneg %p1994_p1 }
  0x6c   : > { %p1635_p12 = scmp.ne.s32.totalorder %s1992_s9, %s1634_s21  ;;  %s1639_s29 = scalar_lea.hbm %s2274_s1, 1024 }
  0x6d   : > { %p1640_p10 = scmp.lt.u32.totalorder %s1992_s9, %s2274_s1  ;;  %p1641_p0 = scmp.lt.u32.totalorder %s1639_s29, %s1634_s21 }
  0x6e   : > { %p1637_p6 = pnand %p1636_p2, %p1635_p12  ;;  %p1643_p11 = scmp.lt.u32.totalorder %s1634_s21, %s1992_s9 }
  0x6f   : > { %p1642_p3 = por %p1641_p0, %p1640_p10 }
  0x70   : > { %p1638_p8 = pneg %p1637_p6 }
  0x71   : > { %p1644_p13 = por %p1643_p11, %p1642_p3 }
  0x73   : > { %p1645_p5 = pnand %p1644_p13, %p1638_p8 }
  0x75   : > { %1648 = shalt.err (!%p1645_p5)
}
  0x76   : > { %s1649_s27 = scalar_lea.vmem %s1998_s22, 512  ;;  %s1778_s28 = smov [#allocation7]  }
  0x77   : > { %p1650_p4 = scmp.ne.s32.totalorder %s1998_s22, %s1649_s27  ;;  %s1654_s25 = sshll.u32 %s1778_s28, 4  ;;  %s1655_s25 = int_to_ptr.vmem [resolvable:$false] %s1654_s25 }
  0x78   : > { %s1656_s30 = scalar_lea.vmem %s1655_s25, 1024  ;;  %p1657_p6 = scmp.lt.s32.totalorder %s1998_s22, %s1655_s25 }
  0x79   : > { %p1652_p7 = pnand %p1650_p4, %p1636_p2  ;;  %p1658_p10 = scmp.lt.s32.totalorder %s1656_s30, %s1649_s27 }
  0x7b   : > { %p1653_p12 = pneg %p1652_p7  ;;  %p1659_p0 = por %p1658_p10, %p1657_p6 }
  0x7d   : > { %p1660_p3 = pnand %p1659_p0, %p1653_p12 }
  0x7f   : > { %1663 = shalt.err (!%p1660_p3)
}
  0x80   : > { %1473 = dma.hbm_to_vmem [thread:$0]  (!%p1994_p1), %s1992_s9, 512, %s1998_s22, %s2000_s23, %s1776_s10, %s1776_s10, %s1777_s15  }
  0x81   : > { %p2292_p2 = scmp.ne.s32.totalorder %s2286_s18, 0 }
  0x82   : > { %s2034_s21 = sand.u32 (!%p2292_p2), 1, %s1762_s12   ;;  %p2293_p8 = scmp.ne.s32.totalorder (!%p2292_p2), %s2284_s16, 0 }
  0x83   : > { %269 = sbr.rel (%p2292_p2) target bundleno = 1158 (0x486), region = 40  ;;  %s1033_s29 = sshll.u32 (!%p2292_p2), %s2034_s21, 5 }
  0x84   : > { %s272_s20 = scalar_lea.sflag (!%p2292_p2), [#allocation8], %s2034_s21  ;;  %s2038_s27 = scalar_lea.vmem (!%p2292_p2), [#allocation7], %s1033_s29 }
  0x8a   : > { %1737 = dma.done.wait (%p2293_p8), %s272_s20, 512  }
  0x8b   : > { %1739 = vsyncadd (%p2293_p8), %s272_s20, 4294966784  ;;  %p2294_p1 = scmp.eq.s32.totalorder %s1859_s0, 0 }
  0x8d   : > { %1741 = dma.done.wait (%p2294_p1), [#allocation11], 1152   ;;  %p2295_p11 = pmov %p2294_p1 }
  0x8e   : > { %p2296_p13 = pmov %p2294_p1 }
  0x8f   : > { %1743 = vsyncadd (%p2295_p11), [#allocation11], 4294966144 }
  0x90   : > { %1745 = dma.done.wait (%p2296_p13), [#allocation14], 2048   ;;  %p2297_p5 = pmov %p2294_p1 }
  0x91   : > { %s2052_s18 = scalar_lea.vmem [#allocation15], %s1033_s29  ;;  %p2298_p4 = scmp.ne.s32.totalorder %s1859_s0, 0 }
  0x92   : > { %1747 = vsyncadd (%p2297_p5), [#allocation14], 4294965248  ;;  %v322_v0 = vld [vmem:[#allocation10] sm:$0xff] (!%p2298_p4) }
  0x93   : > { %321 = sbr.rel (%p2298_p4) target bundleno = 154 (0x9a), region = 60  ;;  %323 = vst [vmem:[#allocation2] sm:$0xff] (!%p2298_p4), %v322_v0  ;;  %324 = vst [vmem:[#allocation3] sm:$0xff] (!%p2298_p4), %v322_v0 }
  0x9a PF: > { %v462_v1 = vld [vmem:[#allocation13] sm:$0xff]  ;;  %v463_v2 = vld [vmem:[#allocation13 + $0x8] sm:$0xff]  ;;  %v464_v3 = vld [vmem:[#allocation13 + $0x10] sm:$0xff]  ;;  %v1779_v4 = vmov 0.0|0.0   ;;  %s2060_s16 = sshll.u32 %s1859_s0, 2  ;;  %vm1780_vm0 = vmmov 0   ;;  %v446_v37 = vlaneseq }
  0x9b   : > { %1344 = vmatprep.subr.bf16.mxu1 %v1779_v4  ;;  %v2057_v5 = vpack.c.bf16 %v463_v2, %v462_v1  ;;  %v465_v6 = vld [vmem:[#allocation13 + $0x18] sm:$0xff]  ;;  %v329_v7 = vld [vmem:[#allocation12] sm:$0xff]  ;;  %v330_v8 = vld [vmem:[#allocation12 + $0x8] sm:$0xff]  ;;  %v1781_v9 = vmov 0.0   ;;  %s2065_s10 = sadd.s32 4294967295, %s2060_s16  ;;  %vm344_vm1 = vcmask 523264  }
  0x9c   : > { %1220 = vmatprep.mubr.msk.f32.mxu1 %vm1780_vm0, %v1781_v9  ;;  %v2068_v10 = vpack.c.bf16 %v465_v6, %v464_v3  ;;  %v1328_v11 = vpack.c.bf16 %v330_v8, %v329_v7  ;;  %v331_v12 = vld [vmem:[#allocation12 + $0x10] sm:$0xff]  ;;  %v332_v13 = vld [vmem:[#allocation12 + $0x18] sm:$0xff]  ;;  %v466_v14 = vld [vmem:[#allocation13 + $0x20] sm:$0xff]  ;;  %p451_p7 = scmp.gt.s32.totalorder %s2065_s10, 0  ;;  %p1045_p12 = scmp.lt.s32.totalorder %s2065_s10, 7  ;;  %v2103_v41 = vshrl.u32 %v446_v37, 7 }
  0x9d   : > { %1346 = vmatpush3.bf16.msra.mxu1 %v2057_v5  ;;  %v467_v15 = vld [vmem:[#allocation13 + $0x28] sm:$0xff]  ;;  %v1332_v16 = vpack.c.bf16 %v332_v13, %v331_v12  ;;  %v333_v17 = vld [vmem:[#allocation12 + $0x20] sm:$0xff]  ;;  %v468_v20 = vld [vmem:[#allocation13 + $0x30] sm:$0xff]  ;;  %p557_p6 = scmp.gt.s32.totalorder %s2060_s16, 0  ;;  %p1050_p10 = scmp.lt.s32.totalorder %s2060_s16, 7 }
  0x9e   : > { %1347 = vmatprep.subr.bf16.mxu1 %v1779_v4  ;;  %1329 = vmatprep.subr.bf16.mxu0 %v1328_v11  ;;  %v334_v18 = vld [vmem:[#allocation12 + $0x28] sm:$0xff]  ;;  %v2073_v19 = vpack.c.bf16 %v467_v15, %v466_v14  ;;  %v325_v22 = vld [vmem:[%s2038_s27] sm:$0xff]  ;;  %v335_v24 = vld [vmem:[#allocation12 + $0x30] sm:$0xff]  ;;  %s2311_s10 = smov (!%p451_p7, %s2065_s10), 0  ;;  %s449_s23 = sld [smem:[#allocation6 + %s2060_s16]] }
  0x9f   : > { %1331 = vmatpush3.bf16.msra.mxu0 %v1328_v11  ;;  %v1336_v21 = vpack.c.bf16 %v334_v18, %v333_v17  ;;  %v469_v23 = vld [vmem:[#allocation13 + $0x38] sm:$0xff]  ;;  %1182 = vmatprep.mubr.msk.f32.mxu0 %vm344_vm1, %v325_v22  ;;  %v470_v28 = vld [vmem:[#allocation13 + $0x40] sm:$0xff]  ;;  %v471_v29 = vld [vmem:[#allocation13 + $0x48] sm:$0xff]  ;;  %s2313_s10 = smov (!%p1045_p12, %s2311_s10), 7  ;;  %s555_s25 = sadd.s32 1, %s2060_s16 }
  0xa0   : > { %1333 = vmatprep.subr.bf16.mxu0 %v1332_v16  ;;  %v336_v25 = vld [vmem:[#allocation12 + $0x38] sm:$0xff]  ;;  %v2083_v26 = vpack.c.bf16 %v469_v23, %v468_v20  ;;  %v2087_v30 = vpack.c.bf16 %v471_v29, %v470_v28  ;;  %v472_v31 = vld [vmem:[#allocation13 + $0x50] sm:$0xff]  ;;  %s455_s15 = sld [smem:[#allocation6 + %s2313_s10]]  ;;  %v326_v33 = vld [vmem:[%s2038_s27 + $0x8] sm:$0xff]  ;;  %p665_p0 = scmp.gt.s32.totalorder %s555_s25, 0 }
  0xa1   : > { %1349 = vmatpush3.bf16.msra.mxu1 %v2068_v10  ;;  %v1340_v27 = vpack.c.bf16 %v336_v25, %v335_v24  ;;  %v473_v32 = vld [vmem:[#allocation13 + $0x58] sm:$0xff]  ;;  %v474_v35 = vld [vmem:[#allocation13 + $0x60] sm:$0xff]  ;;  %v475_v36 = vld [vmem:[#allocation13 + $0x68] sm:$0xff]  ;;  %s558_s9 = scalar_select %p557_p6, %s2060_s16, 0 }
  0xa2   : > { %1350 = vmatprep.subr.bf16.mxu1 %v1779_v4  ;;  %v2092_v34 = vpack.c.bf16 %v473_v32, %v472_v31  ;;  %v2099_v38 = vpack.c.bf16 %v475_v36, %v474_v35  ;;  %v476_v39 = vld [vmem:[#allocation13 + $0x70] sm:$0xff]  ;;  %v477_v40 = vld [vmem:[#allocation13 + $0x78] sm:$0xff]  ;;  %v458_v44 = vld [vmem:[#allocation2] sm:$0xff]  ;;  %s666_s30 = scalar_select %p665_p0, %s555_s25, 0 }
  0xa3   : > { %1335 = vmatpush3.bf16.msra.mxu0 %v1332_v16  ;;  %v2107_v43 = vpack.c.bf16 %v477_v40, %v476_v39  ;;  %v2112_v45 = vld [vmem:[#allocation3] sm:$0xff]  ;;  %v327_v47 = vld [vmem:[%s2038_s27 + $0x10] sm:$0xff]  ;;  %s2315_s9 = smov (!%p1050_p10, %s558_s9), 7  ;;  %p1056_p3 = scmp.lt.s32.totalorder %s555_s25, 7 }
  0xa4   : > { %1337 = vmatprep.subr.bf16.mxu0 %v1336_v21  ;;  %v328_v48 = vld [vmem:[%s2038_s27 + $0x18] sm:$0xff]  ;;  %v2158_v51 = vld [vmem:[%s2278_s5] ss:$0 sm:$0xff]  ;;  %s561_s28 = sld [smem:[#allocation6 + %s2315_s9]]  ;;  %v550_v56 = vstv %s449_s23  ;;  %s663_s27 = sadd.s32 2, %s2060_s16 }
  0xa5   : > { %1352 = vmatpush3.bf16.msra.mxu1 %v2073_v19  ;;  %vm551_vm3 = vcmp.lt.s32.totalorder %v2103_v41, %v550_v56  ;;  %s2317_s30 = smov (!%p1056_p3, %s666_s30), 7  ;;  %s556_s29 = sld [smem:[#allocation6 + %s555_s25]] }
  0xa6   : > { %1353 = vmatprep.subr.bf16.mxu1 %v1779_v4  ;;  %v456_v42 = vstv %s455_s15  ;;  %s669_s20 = sld [smem:[#allocation6 + %s2317_s30]]  ;;  %p773_p2 = scmp.gt.s32.totalorder %s663_s27, 0 }
  0xa7   : > { %1339 = vmatpush3.bf16.msra.mxu0 %v1336_v21  ;;  %vm457_vm2 = vcmp.lt.s32.totalorder %v2103_v41, %v456_v42  ;;  %p1062_p8 = scmp.lt.s32.totalorder %s663_s27, 7  ;;  %s664_s15 = sld [smem:[#allocation6 + %s663_s27]] }
  0xa8   : > { %1341 = vmatprep.subr.bf16.mxu0 %v1340_v27  ;;  %v460_v46 = vsel %vm457_vm2, %v458_v44, %v2112_v45  ;;  %s774_s10 = scalar_select %p773_p2, %s663_s27, 0 }
  0xa9   : > { %1355 = vmatpush3.bf16.msra.mxu1 %v2083_v26  ;;  %s771_s22 = sadd.s32 3, %s2060_s16  ;;  %p1068_p1 = scmp.ne.s32.totalorder %s1859_s0, 1 }
  0xaa   : > { %1356 = vmatprep.subr.bf16.mxu1 %v1779_v4  ;;  %v562_v57 = vstv %s561_s28  ;;  %s2319_s10 = smov (!%p1062_p8, %s774_s10), 7  ;;  %s772_s19 = sld [smem:[#allocation6 + %s771_s22]] }
  0xab   : > { %1343 = vmatpush3.bf16.msra.mxu0 %v1340_v27  ;;  %vm563_vm4 = vcmp.lt.s32.totalorder %v2103_v41, %v562_v57  ;;  %v657_v3 = vstv %s556_s29  ;;  %s777_s9 = sld [smem:[#allocation6 + %s2319_s10]] }
  0xac   : > { %1368 = vmatprep.subr.bf16.mxu0 %v1779_v4  ;;  %vm658_vm5 = vcmp.lt.s32.totalorder %v2103_v41, %v657_v3 }
  0xad   : > { %1358 = vmatpush3.bf16.msra.mxu1 %v2087_v30  ;;  %v765_v12 = vstv %s664_s15 }
  0xae   : > { %1359 = vmatprep.subr.bf16.mxu1 %v1779_v4  ;;  %1183 = vmatmul.mubr.msk.f32.vlgmr.msra.gmra.mrb[0].mxu0 %vm344_vm1, %v326_v33  ;;  %vm766_vm7 = vcmp.lt.s32.totalorder %v2103_v41, %v765_v12 }
  0xaf   : > { %1370 = vmatpush3.bf16.msra.mxu0 %v2057_v5  ;;  %1185 = vmatprep.mubr.msk.f32.mxu0 %vm344_vm1, %v327_v47 }
  0xb0   : > { %1371 = vmatprep.subr.bf16.mxu0 %v1779_v4  ;;  %v873_v21 = vstv %s772_s19 }
  0xb1   : > { %1361 = vmatpush3.bf16.msra.mxu1 %v2092_v34  ;;  %v778_v13 = vstv %s777_s9  ;;  %vm874_vm9 = vcmp.lt.s32.totalorder %v2103_v41, %v873_v21 }
  0xb2   : > { %1362 = vmatprep.subr.bf16.mxu1 %v1779_v4  ;;  %1186 = vmatmul.mubr.msk.f32.gmra.mrb[2].mxu0 %vm344_vm1, %v328_v48  ;;  %vm779_vm8 = vcmp.lt.s32.totalorder %v2103_v41, %v778_v13 }
  0xb3   : > { %1373 = vmatpush3.bf16.msra.mxu0 %v2068_v10  ;;  %1255 = vmatprep.mubr.msk.f32.mxu0 %vm1780_vm0, %v1781_v9 }
  0xb4   : > { %1374 = vmatprep.subr.bf16.mxu0 %v1779_v4 }
  0xb5   : > { %1364 = vmatpush3.bf16.msra.mxu1 %v2099_v38 }
  0xb6   : > { %1365 = vmatprep.subr.bf16.mxu1 %v1779_v4 }
  0xb7   : > { %1376 = vmatpush3.bf16.msra.mxu0 %v2073_v19 }
  0xb8   : > { %1377 = vmatprep.subr.bf16.mxu0 %v1779_v4 }
  0xb9   : > { %1367 = vmatpush3.bf16.msra.mxu1 %v2107_v43 }
  0xba   : > { %1392 = vmatprep.subr.bf16.mxu1 %v1779_v4 }
  0xbb   : > { %1379 = vmatpush3.bf16.msra.mxu0 %v2083_v26 }
  0xbc   : > { %1221 = vmatmul.mubr.f32.vlgmr.msra.gmra.mrb[0].mxu1 %v460_v46  ;;  %1380 = vmatprep.subr.bf16.mxu0 %v1779_v4 }
  0xbd   : > { %1394 = vmatpush3.bf16.msra.mxu1 %v2057_v5  ;;  %1290 = vmatprep.mubr.msk.f32.mxu1 %vm1780_vm0, %v1781_v9 }
  0xbe   : > { %1395 = vmatprep.subr.bf16.mxu1 %v1779_v4 }
  0xbf   : > { %1382 = vmatpush3.bf16.msra.mxu0 %v2087_v30 }
  0xc0   : > { %1383 = vmatprep.subr.bf16.mxu0 %v1779_v4 }
  0xc1   : > { %1397 = vmatpush3.bf16.msra.mxu1 %v2068_v10 }
  0xc2   : > { %1398 = vmatprep.subr.bf16.mxu1 %v1779_v4 }
  0xc3   : > { %1385 = vmatpush3.bf16.msra.mxu0 %v2092_v34 }
  0xc4   : > { %1386 = vmatprep.subr.bf16.mxu0 %v1779_v4 }
  0xc5   : > { %1400 = vmatpush3.bf16.msra.mxu1 %v2073_v19 }
  0xc6   : > { %1401 = vmatprep.subr.bf16.mxu1 %v1779_v4 }
  0xc7   : > { %1388 = vmatpush3.bf16.msra.mxu0 %v2099_v38 }
  0xc8   : > { %1389 = vmatprep.subr.bf16.mxu0 %v1779_v4 }
  0xc9   : > { %1403 = vmatpush3.bf16.msra.mxu1 %v2083_v26 }
  0xca   : > { %1404 = vmatprep.subr.bf16.mxu1 %v1779_v4 }
  0xcb   : > { %1391 = vmatpush3.bf16.msra.mxu0 %v2107_v43 }
  0xcc   : > { %1416 = vmatprep.subr.bf16.mxu0 %v1779_v4 }
  0xcd   : > { %1406 = vmatpush3.bf16.msra.mxu1 %v2087_v30 }
  0xce   : > { %1407 = vmatprep.subr.bf16.mxu1 %v1779_v4 }
  0xd1   : > { %1409 = vmatpush3.bf16.msra.mxu1 %v2092_v34 }
  0xd2   : > { %1410 = vmatprep.subr.bf16.mxu1 %v1779_v4 }
  0xd5   : > { %1412 = vmatpush3.bf16.msra.mxu1 %v2099_v38 }
  0xd6   : > { %1413 = vmatprep.subr.bf16.mxu1 %v1779_v4 }
  0xd9   : > { %1415 = vmatpush3.bf16.msra.mxu1 %v2107_v43 }
 0x181   : > { %v1184_v49 = vpop.f32.mrb[0].mxu0 }
 0x182   : > { %v423_v50 = vpop.f32.mrb[1].mxu0  ;;  %v429_v63 = vadd.f32 %v1184_v49, %v2158_v51 }
 0x183   : > { %v424_v52 = vadd.f32 %v2158_v51, %v423_v50 }
 0x185   : > { %v1187_v61 = vpop.f32.mrb[2].mxu0 }
 0x186   : > { %v433_v62 = vpop.f32.mrb[3].mxu0  ;;  %v439_v17 = vadd.f32 %v1187_v61, %v2158_v51 }
 0x187   : > { %v434_v8 = vadd.f32 %v2158_v51, %v433_v62 }
 0x18f   : > { %v544_v53 = vpop.f32.mrb[0].mxu1 }
 0x190   : > { %v548_v54 = vadd.f32 %v544_v53, %v424_v52  ;;  %v1222_v55 = vpop.f32.mrb[1].mxu1 }
 0x192   : > { %1532 = vtanh.f32 %v548_v54 }
 0x19c   : > { %v1533_v58 = vpop.eup %1532 }
 0x19d   : > { %v552_v59 = vsel %vm551_vm3, %v1533_v58, %v458_v44  ;;  %554 = vst [vmem:[%s2052_s18] sm:$0xff] %v1533_v58 }
 0x19e   : > { %v566_v60 = vsel %vm563_vm4, %v552_v59, %v2112_v45 }
 0x19f   : > { %1256 = vmatmul.mubr.f32.vlgmr.msra.gmra.mrb[4].mxu0 %v566_v60 }
 0x1a0   : > { %1418 = vmatpush3.bf16.msra.mxu0 %v2057_v5  ;;  %1325 = vmatprep.mubr.msk.f32.mxu0 %vm1780_vm0, %v1781_v9 }
 0x1a1   : > { %1419 = vmatprep.subr.bf16.mxu0 %v1779_v4 }
 0x1a4   : > { %1421 = vmatpush3.bf16.msra.mxu0 %v2068_v10 }
 0x1a5   : > { %1422 = vmatprep.subr.bf16.mxu0 %v1779_v4 }
 0x1a8   : > { %1424 = vmatpush3.bf16.msra.mxu0 %v2073_v19 }
 0x1a9   : > { %1425 = vmatprep.subr.bf16.mxu0 %v1779_v4 }
 0x1ac   : > { %1427 = vmatpush3.bf16.msra.mxu0 %v2083_v26 }
 0x1ad   : > { %1428 = vmatprep.subr.bf16.mxu0 %v1779_v4 }
 0x1b0   : > { %1430 = vmatpush3.bf16.msra.mxu0 %v2087_v30 }
 0x1b1   : > { %1431 = vmatprep.subr.bf16.mxu0 %v1779_v4 }
 0x1b4   : > { %1433 = vmatpush3.bf16.msra.mxu0 %v2092_v34 }
 0x1b5   : > { %1434 = vmatprep.subr.bf16.mxu0 %v1779_v4 }
 0x1b8   : > { %1436 = vmatpush3.bf16.msra.mxu0 %v2099_v38 }
 0x1b9   : > { %1437 = vmatprep.subr.bf16.mxu0 %v1779_v4  ;;  %v670_v4 = vstv %s669_s20 }
 0x1ba   : > { %vm671_vm6 = vcmp.lt.s32.totalorder %v2103_v41, %v670_v4 }
 0x1bc   : > { %1439 = vmatpush3.bf16.msra.mxu0 %v2107_v43 }
 0x272   : > { %v651_v0 = vpop.f32.mrb[4].mxu0 }
 0x273   : > { %v655_v1 = vadd.f32 %v651_v0, %v429_v63  ;;  %v1257_v2 = vpop.f32.mrb[5].mxu0 }
 0x275   : > { %1534 = vtanh.f32 %v655_v1 }
 0x27f   : > { %v1535_v5 = vpop.eup %1534 }
 0x280   : > { %1055 = vst [vmem:[%s2052_s18 + $0x8] sm:$0xff] %v1535_v5  ;;  %v659_v6 = vsel %vm658_vm5, %v1535_v5, %v552_v59 }
 0x281   : > { %v674_v7 = vsel %vm671_vm6, %v659_v6, %v2112_v45 }
 0x282   : > { %1291 = vmatmul.mubr.f32.vlgmr.msra.gmra.mrb[2].mxu1 %v674_v7 }
 0x355   : > { %v759_v9 = vpop.f32.mrb[2].mxu1 }
 0x356   : > { %v763_v10 = vadd.f32 %v759_v9, %v434_v8  ;;  %v1292_v11 = vpop.f32.mrb[3].mxu1 }
 0x358   : > { %1536 = vtanh.f32 %v763_v10 }
 0x362   : > { %v1537_v14 = vpop.eup %1536 }
 0x363   : > { %1061 = vst [vmem:[%s2052_s18 + $0x10] sm:$0xff] %v1537_v14  ;;  %v767_v15 = vsel %vm766_vm7, %v1537_v14, %v659_v6 }
 0x364   : > { %v782_v16 = vsel %vm779_vm8, %v767_v15, %v2112_v45 }
 0x365   : > { %1326 = vmatmul.mubr.f32.vlgmr.msra.gmra.mrb[6].mxu0 %v782_v16 }
 0x438   : > { %v867_v18 = vpop.f32.mrb[6].mxu0 }
 0x439   : > { %v871_v19 = vadd.f32 %v867_v18, %v439_v17  ;;  %v1327_v20 = vpop.f32.mrb[7].mxu0 }
 0x43b   : > { %1538 = vtanh.f32 %v871_v19 }
 0x441   : > { %882 = sbr.rel (%p1068_p1) target bundleno = 1104 (0x450), region = 64 }
 0x445   : > { %v1539_v22 = vpop.eup %1538 }
 0x446   : > { %v875_v23 = vsel %vm874_vm9, %v1539_v22, %v767_v15  ;;  %1067 = vst [vmem:[%s2052_s18 + $0x18] sm:$0xff] %v1539_v22 }
 0x447   : > { %876 = vst [vmem:[#allocation2] sm:$0xff] %v875_v23 }
 0x44e   : > { %v883_v24 = vld [vmem:[#allocation2] sm:$0xff] }
 0x44f   : > { %884 = vst [vmem:[#allocation16] sm:$0xff] %v883_v24 }
 0x450 PF: > { %s1085_s16 = sshll.u32 %s1859_s0, 9  ;;  %s899_s30 = sshll.u32 %s2052_s18, 4  ;;  %s2207_s30 = int_to_ptr.vmem [resolvable:$true] %s899_s30 }
 0x451   : > { %s2204_s25 = scalar_lea.hbm %s2279_s6, %s1085_s16  ;;  %s886_s29 = scalar_lea.sflag [#allocation9], %s2034_s21 }
 0x452   : > { %s1664_s20 = scalar_lea.vmem %s2207_s30, 512  ;;  %s1782_s27 = smov [#allocation15]  }
 0x453   : > { %p1665_p11 = scmp.ne.s32.totalorder %s2207_s30, %s1664_s20  ;;  %s1668_s10 = sshll.u32 %s1782_s27, 4  ;;  %s1669_s10 = int_to_ptr.vmem [resolvable:$false] %s1668_s10 }
 0x454   : > { %s1670_s15 = scalar_lea.vmem %s1669_s10, 1024  ;;  %p1671_p4 = scmp.lt.s32.totalorder %s2207_s30, %s1669_s10 }
 0x455   : > { %p1666_p13 = pnand %p1665_p11, %p1983_p9  ;;  %p1672_p7 = scmp.lt.s32.totalorder %s1670_s15, %s1664_s20 }
 0x457   : > { %p1667_p5 = pneg %p1666_p13  ;;  %p1673_p12 = por %p1672_p7, %p1671_p4 }
 0x459   : > { %p1674_p6 = pnand %p1673_p12, %p1667_p5 }
 0x45b   : > { %1677 = shalt.err (!%p1674_p6)
}
 0x45c   : > { %s1678_s18 = scalar_lea.hbm %s2204_s25, 512  ;;  %s1682_s19 = scalar_lea.hbm %s2279_s6, 1024 }
 0x45d   : > { %p1679_p10 = scmp.ne.s32.totalorder %s2204_s25, %s1678_s18  ;;  %p1683_p2 = scmp.lt.u32.totalorder %s2204_s25, %s2279_s6 }
 0x45e   : > { %p1684_p8 = scmp.lt.u32.totalorder %s1682_s19, %s1678_s18  ;;  %p1686_p11 = scmp.lt.u32.totalorder %s1678_s18, %s2204_s25 }
 0x45f   : > { %p1680_p0 = pnand %p1679_p10, %p1983_p9 }
 0x460   : > { %p1685_p1 = por %p1684_p8, %p1683_p2 }
 0x461   : > { %p1681_p3 = pneg %p1680_p0 }
 0x462   : > { %p1687_p13 = por %p1686_p11, %p1685_p1 }
 0x464   : > { %p1688_p5 = pnand %p1687_p13, %p1681_p3 }
 0x466   : > { %1691 = shalt.err (!%p1688_p5)
}
 0x467   : > { %s1783_s28 = smov 128   ;;  %s1784_s20 = smov 8  }
 0x468   : > { %1454 = dma.vmem_to_hbm [thread:$0]  (%p1983_p9), %s2207_s30, 512, %s2204_s25, %s886_s29, %s1783_s28, %s1783_s28, %s1784_s20  }
 0x469   : > { %s1785_s27 = smov [#allocation16]   ;;  %p2299_p7 = scmp.eq.s32.totalorder %s1859_s0, 1 }
 0x46a   : > { %s913_s10 = sshll.u32 %s1785_s27, 4  ;;  %s914_s10 = int_to_ptr.vmem [resolvable:$true] %s913_s10 }
 0x46b   : > { %s1692_s15 = scalar_lea.vmem %s914_s10, 128  ;;  %p1699_p10 = scmp.lt.s32.totalorder %s914_s10, %s914_s10 }
 0x46c   : > { %p1693_p4 = scmp.ne.s32.totalorder %s914_s10, %s1692_s15  ;;  %p1700_p0 = scmp.lt.s32.totalorder %s1692_s15, %s1692_s15 }
 0x46e   : > { %p1694_p12 = pnand %p1693_p4, %p2299_p7  ;;  %p1701_p3 = por %p1700_p0, %p1699_p10 }
 0x470   : > { %p1695_p6 = pneg %p1694_p12 }
 0x472   : > { %p1702_p2 = pnand %p1701_p3, %p1695_p6 }
 0x474   : > { %1705 = shalt.err (!%p1702_p2)
}
 0x475   : > { %s1706_s26 = scalar_lea.hbm %s2280_s7, 128  ;;  %p2300_p8 = pmov %p2299_p7 }
 0x476   : > { %p1707_p9 = scmp.ne.s32.totalorder %s2280_s7, %s1706_s26  ;;  %p1712_p13 = scmp.lt.u32.totalorder %s1706_s26, %s2280_s7 }
 0x478   : > { %p1708_p1 = pnand %p1707_p9, %p2300_p8 }
 0x47a   : > { %p1709_p11 = pneg %p1708_p1 }
 0x47c   : > { %p1714_p5 = pnand %p1712_p13, %p1709_p11 }
 0x47e   : > { %1717 = shalt.err (!%p1714_p5)
}
 0x47f   : > { %p2301_p4 = pmov %p2299_p7 }
 0x481   : > { %1456 = dma.vmem_to_hbm [thread:$0]  (%p2301_p4), %s914_s10, 128, %s2280_s7, [#allocation17]  }
 0x482   : > { %p2302_p7 = pmov %p2301_p4 }
 0x483   : > { %p2303_p12 = pmov %p2301_p4 }
 0x484   : > { %1749 = dma.done.wait (%p2302_p7), [#allocation17], 128  }
 0x485   : > { %1751 = vsyncadd (%p2303_p12), [#allocation17], 4294967168 }
 0x486 PF: > { %s929_s16 = sand.u32 1, %s1758_s11   ;;  %p2304_p6 = scmp.ne.s32.totalorder %s2285_s17, 0 }
 0x487   : > { %p2305_p10 = scmp.ge.s32.totalorder %s1770_s14, 2  ;;  %s930_s23 = scalar_lea.sflag [#allocation9], %s929_s16 }
 0x489   : > { %p1475_p0 = pnand %p2305_p10, %p2304_p6 }
 0x48b   : > { %1753 = dma.done.wait (!%p1475_p0), %s930_s23, 512  }
 0x48c   : > { %1755 = vsyncadd (!%p1475_p0), %s930_s23, 4294966784  ;;  %p28_p3 = scmp.ge.s32.totalorder %s1969_s8, 4   ;;  %s2306_s11 = smov %s1762_s12 }
 0x48d   : > { %s2307_s12 = smov %s1766_s13  ;;  %s2308_s13 = smov %s1979_s24 }
 0x48e   : > { %s2309_s14 = smov %s1969_s8  ;;  %30 = sbr.rel (!%p28_p3) target bundleno = 20 (0x14), region = 119 }
 0x495   :  { %935 = vsyncpa [#allocation8], 1 }
 0x496   :  { %937 = vsyncpa [#allocation8 + $0x1], 1 }
 0x497   :  { %938 = vsyncpa [#allocation11], 1 }
 0x498   :  { %939 = vsyncpa [#allocation14], 1 }
 0x499   :  { %940 = vsyncpa [#allocation9], 1 }
 0x49a   :  { %942 = vsyncpa [#allocation9 + $0x1], 1 }
 0x49b   :  { %943 = vsyncpa [#allocation17], 1 }

</bundles_post_ra>
